<compile_context>
chip_gen: v6e
topology: v6e:2x2x1
jax: 0.10.0
libtpu: 0.0.40
codegen_flags: <defaults>
</compile_context>

<pallas_src>
import functools
import math

import jax
import jax.numpy as jnp
from jax import lax
from jax.experimental import pallas as pl
from jax.experimental.pallas import tpu as pltpu

EPS = 1e-8                      # RMSNorm eps (module default)
INV_SQRT2 = 0.7071067811865475  # 1/sqrt(2) for exact (erf) GELU
NEG_BIG = -1e30                 # large finite negative for the causal mask


def subblock_kernel(x_ref, wqkv_ref, wo_ref, w1_ref, b1_ref, w2_ref, b2_ref,
                    o_ref, ctx_ref, *, n_heads, head_size, eps, approx_recip):
    BT, S, E = x_ref.shape
    M = BT * S
    cdt = wqkv_ref.dtype        # MXU operand dtype (bf16 fast path or f32)

    x = x_ref[...].astype(jnp.float32)          # (BT, S, E)
    xf = x.reshape(M, E)                        # flatten batch*seq into matmul M

    # ---- RMSNorm #1 (scale s1 folded into W_qkv on the host); exact recip ----
    rms1 = jnp.sqrt(jnp.sum(xf * xf, axis=-1, keepdims=True)) * (E ** -0.5)
    h1 = xf * pl.reciprocal(rms1 + eps, approx=False)

    # ---- QKV projection (1/sqrt(head_size) already folded into Q columns) ----
    qkv = jnp.dot(h1.astype(cdt), wqkv_ref[...],
                  preferred_element_type=jnp.float32)      # (M, 3E) f32

    # causal mask built once at (1, S, S); broadcasts over the BT sequences
    row = lax.broadcasted_iota(jnp.int32, (1, S, S), 1)
    col = lax.broadcasted_iota(jnp.int32, (1, S, S), 2)
    masked = col > row
    neg = jnp.float32(NEG_BIG)

    # ---- per-head attention; contexts land in a (M, E) VMEM scratch ----------
    for h_idx in range(n_heads):                           # small static loop
        lo = h_idx * head_size
        hi = lo + head_size
        qh = qkv[:, lo:hi].reshape(BT, S, head_size).astype(cdt)
        kh = qkv[:, E + lo:E + hi].reshape(BT, S, head_size).astype(cdt)
        vh = qkv[:, 2 * E + lo:2 * E + hi].reshape(BT, S, head_size).astype(cdt)

        s = jnp.einsum('bqd,bkd->bqk', qh, kh,
                       preferred_element_type=jnp.float32)  # (BT, S, S)
        s = jnp.where(masked, neg, s)
        s = s - jnp.max(s, axis=-1, keepdims=True)
        p = jnp.exp(s)
        p = p * pl.reciprocal(jnp.sum(p, axis=-1, keepdims=True),
                              approx=approx_recip)

        ctx = jnp.einsum('bqk,bkd->bqd', p.astype(cdt), vh,
                         preferred_element_type=jnp.float32)  # (BT, S, hd)
        ctx_ref[:, lo:hi] = ctx.reshape(M, head_size).astype(ctx_ref.dtype)

    # single K=E GEMM through W_o (replaces n_heads K=head_size dots + adds)
    attn_out = jnp.dot(ctx_ref[...], wo_ref[...],
                       preferred_element_type=jnp.float32)   # (M, E) f32
    x1 = xf + attn_out                                       # first residual

    # ---- RMSNorm #2 (scale s2 folded into W_fc1 on the host); exact recip ----
    rms2 = jnp.sqrt(jnp.sum(x1 * x1, axis=-1, keepdims=True)) * (E ** -0.5)
    h2 = x1 * pl.reciprocal(rms2 + eps, approx=False)

    # ---- MLP: fc1 -> exact (erf) GELU -> fc2 ----
    hid = jnp.dot(h2.astype(cdt), w1_ref[...],
                  preferred_element_type=jnp.float32) + b1_ref[0]
    hid = 0.5 * hid * (1.0 + lax.erf(hid * INV_SQRT2))
    mlp = jnp.dot(hid.astype(cdt), w2_ref[...],
                  preferred_element_type=jnp.float32) + b2_ref[0]

    o_ref[...] = (x1 + mlp).reshape(BT, S, E).astype(o_ref.dtype)


def _derive_vmem_limit_bytes():
    """Generation-aware VMEM cap: ~75% of physical VMEM, bounded to 32..110 MiB."""
    try:
        cap = int(pltpu.get_tpu_info().vmem_capacity_bytes)
    except Exception:
        cap = 64 * 1024 * 1024          # conservative fallback (v7x per-TC VMEM)
    return max(32 * 1024 * 1024, min(cap * 3 // 4, 110 * 1024 * 1024))


def subblock_forward(x, params, n_heads, *, use_bf16=True, block_batch=None):
    N, S, E = x.shape
    assert E % n_heads == 0
    hd = E // n_heads
    H4 = 4 * E
    approx_recip = bool(use_bf16)

    # ---- host-side weight prep: fold RMSNorm scales and attention scale ----
    s1 = params["s1"].reshape(E)
    s2 = params["s2"].reshape(E)
    wqkv = params["wqkv_t"] * s1[:, None]                  # diag(s1) @ W_qkv^T
    wqkv = wqkv.at[:, :E].multiply(1.0 / math.sqrt(hd))    # scale Q columns only
    wo = params["wo_t"]
    w1 = params["w1_t"] * s2[:, None]                      # diag(s2) @ W_fc1^T
    w2 = params["w2_t"]

    cdt = jnp.bfloat16 if use_bf16 else jnp.float32
    wqkv = wqkv.astype(cdt)
    wo = wo.astype(cdt)
    w1 = w1.astype(cdt)
    w2 = w2.astype(cdt)
    b1 = params["b1"].reshape(1, H4).astype(jnp.float32)   # biases stay f32
    b2 = params["b2"].reshape(1, E).astype(jnp.float32)

    # ---- batch tile: target ~512 matmul rows (M = BT*S), keep >= 2 grid steps ----
    if block_batch is None:
        bt = max(1, min(N, 512 // max(S, 1)))
        if N >= 2:
            bt = min(bt, max(1, N // 2))   # >= 2 steps so both TCs get work
        while N % bt:
            bt -= 1
    else:
        bt = block_batch
        assert N % bt == 0
    grid = (N // bt,)

    kernel = functools.partial(subblock_kernel, n_heads=n_heads, head_size=hd,
                               eps=EPS, approx_recip=approx_recip)
    const = lambda b: (0, 0)
    vmem_limit = _derive_vmem_limit_bytes()

    def make_call(single_buffer_weights):
        def wspec(shape):
            if single_buffer_weights:
                return pl.BlockSpec(shape, const, pipeline_mode=pl.Buffered(1))
            return pl.BlockSpec(shape, const)

        return pl.pallas_call(
            kernel,
            out_shape=jax.ShapeDtypeStruct((N, S, E), x.dtype),
            grid_spec=pltpu.PrefetchScalarGridSpec(
                num_scalar_prefetch=0,
                grid=grid,
                in_specs=[
                    pl.BlockSpec((bt, S, E), lambda b: (b, 0, 0)),   # x
                    wspec((E, 3 * E)),                               # folded W_qkv^T
                    wspec((E, E)),                                   # W_o^T
                    wspec((E, H4)),                                  # folded W_fc1^T
                    wspec((1, H4)),                                  # b_fc1
                    wspec((H4, E)),                                  # W_fc2^T
                    wspec((1, E)),                                   # b_fc2
                ],
                out_specs=pl.BlockSpec((bt, S, E), lambda b: (b, 0, 0)),
                scratch_shapes=[pltpu.VMEM((bt * S, E), cdt)],       # ctx slab
            ),
            compiler_params=pltpu.CompilerParams(
                dimension_semantics=("parallel",),
                vmem_limit_bytes=vmem_limit,
            ),
        )

    args = (x, wqkv, wo, w1, b1, w2, b2)
    try:
        return make_call(True)(*args)
    except Exception:
        # TODO(synk): drop this fallback once pl.Buffered(1) on constant-index
        # weight blocks is confirmed on the deployed JAX version.
        return make_call(False)(*args)


def subblock_reference(x, params, n_heads):
    """Pure-JAX re-implementation of SubBlock.forward (faithful to the PyTorch spec)."""
    N, S, E = x.shape
    hd = E // n_heads
    s1 = params["s1"].reshape(E)
    s2 = params["s2"].reshape(E)

    def rmsnorm(v, scale):
        norm = jnp.linalg.norm(v, axis=-1, keepdims=True)
        rms = norm * (E ** -0.5)
        return scale * (v / (rms + EPS))

    h = rmsnorm(x, s1)
    qkv = h @ params["wqkv_t"]
    q, k, v = jnp.split(qkv, 3, axis=-1)
    q = q.reshape(N, S, n_heads, hd).transpose(0, 2, 1, 3)
    k = k.reshape(N, S, n_heads, hd).transpose(0, 2, 1, 3)
    v = v.reshape(N, S, n_heads, hd).transpose(0, 2, 1, 3)
    logits = jnp.einsum("bhqd,bhkd->bhqk", q, k) / math.sqrt(hd)
    mask = jnp.triu(jnp.ones((S, S), bool), k=1)
    logits = jnp.where(mask[None, None], -jnp.inf, logits)
    attn = jax.nn.softmax(logits, axis=-1)
    ctx = jnp.einsum("bhqk,bhkd->bhqd", attn, v).transpose(0, 2, 1, 3).reshape(N, S, E)
    x1 = x + ctx @ params["wo_t"]

    h2 = rmsnorm(x1, s2)
    hid = h2 @ params["w1_t"] + params["b1"].reshape(-1)
    hid = 0.5 * hid * (1.0 + lax.erf(hid * INV_SQRT2))
    return x1 + hid @ params["w2_t"] + params["b2"].reshape(-1)


if __name__ == "__main__":
    # small shapes consistent with the module's forward
    N, S, E, HEADS = 2, 8, 32, 4

    key = jax.random.PRNGKey(0)
    kx, ks1, ks2, kqkv, ko, k1, kb1, k2, kb2 = jax.random.split(key, 9)

    x = jax.random.normal(kx, (N, S, E), jnp.float32)

    # PyTorch Linear stores [out, in]; weights here are already [in, out] (y = x @ W).
    params = {
        "s1": 1.0 + 0.1 * jax.random.normal(ks1, (1, E), jnp.float32),
        "wqkv_t": jax.random.normal(kqkv, (E, 3 * E), jnp.float32) / math.sqrt(E),
        "wo_t": jax.random.normal(ko, (E, E), jnp.float32) / math.sqrt(E),
        "s2": 1.0 + 0.1 * jax.random.normal(ks2, (1, E), jnp.float32),
        "w1_t": jax.random.normal(k1, (E, 4 * E), jnp.float32) / math.sqrt(E),
        "b1": 0.02 * jax.random.normal(kb1, (1, 4 * E), jnp.float32),
        "w2_t": jax.random.normal(k2, (4 * E, E), jnp.float32) / math.sqrt(4 * E),
        "b2": 0.02 * jax.random.normal(kb2, (1, E), jnp.float32),
    }

    ref = subblock_reference(x, params, HEADS)

    # exact-precision path: tight correctness check
    out_f32 = jax.block_until_ready(subblock_forward(x, params, HEADS, use_bf16=False))
    assert out_f32.shape == (N, S, E) and out_f32.dtype == jnp.float32
    assert jnp.allclose(out_f32, ref, rtol=2e-4, atol=2e-4), "f32 kernel/reference mismatch"

    # bf16 fast path (MXU-native operands, f32 accumulation): loose check
    out_bf16 = jax.block_until_ready(subblock_forward(x, params, HEADS, use_bf16=True))
    assert out_bf16.shape == (N, S, E) and out_bf16.dtype == jnp.float32
    assert bool(jnp.all(jnp.isfinite(out_bf16)))
    assert jnp.allclose(out_bf16, ref, rtol=1e-1, atol=1e-1), "bf16 kernel/reference mismatch"

    print("KERNEL_OK")
</pallas_src>

<mosaic_0001>
module attributes {stable_mosaic.version = 11 : i64} {
  func.func @subblock_kernel(%arg0: i32, %arg1: memref<1x8x32xf32, #tpu.memory_space<vmem>>, %arg2: memref<32x96xf32, #tpu.memory_space<vmem>>, %arg3: memref<32x32xf32, #tpu.memory_space<vmem>>, %arg4: memref<32x128xf32, #tpu.memory_space<vmem>>, %arg5: memref<1x128xf32, #tpu.memory_space<vmem>>, %arg6: memref<128x32xf32, #tpu.memory_space<vmem>>, %arg7: memref<1x32xf32, #tpu.memory_space<vmem>>, %arg8: memref<1x8x32xf32, #tpu.memory_space<vmem>>, %arg9: memref<8x32xf32, #tpu.memory_space<vmem>>) attributes {dimension_semantics = [#tpu.dimension_semantics<parallel>], iteration_bounds = array<i64: 2>, scalar_prefetch = 0 : i64, scratch_operands = 1 : i64, tpu.core_type = #tpu.core_type<tc>, window_params = [{transform_indices = @transform_0, window_bounds = array<i64: 1, 8, 32>}, {pipeline_mode = #tpu.pipeline_mode<synchronous>, transform_indices = @transform_1, window_bounds = array<i64: 32, 96>}, {pipeline_mode = #tpu.pipeline_mode<synchronous>, transform_indices = @transform_2, window_bounds = array<i64: 32, 32>}, {pipeline_mode = #tpu.pipeline_mode<synchronous>, transform_indices = @transform_3, window_bounds = array<i64: 32, 128>}, {pipeline_mode = #tpu.pipeline_mode<synchronous>, transform_indices = @transform_4, window_bounds = array<i64: 1, 128>}, {pipeline_mode = #tpu.pipeline_mode<synchronous>, transform_indices = @transform_5, window_bounds = array<i64: 128, 32>}, {pipeline_mode = #tpu.pipeline_mode<synchronous>, transform_indices = @transform_6, window_bounds = array<i64: 1, 32>}, {transform_indices = @transform_7, window_bounds = array<i64: 1, 8, 32>}]} {
    %c0 = arith.constant 0 : index
    %c0_0 = arith.constant 0 : index
    %c0_1 = arith.constant 0 : index
    %0 = vector.load %arg1[%c0, %c0_0, %c0_1] : memref<1x8x32xf32, #tpu.memory_space<vmem>>, vector<1x8x32xf32>
    %1 = vector.shape_cast %0 : vector<1x8x32xf32> to vector<8x32xf32>
    %2 = arith.mulf %1, %1 : vector<8x32xf32>
    %cst = arith.constant dense<0.000000e+00> : vector<8xf32>
    %3 = vector.multi_reduction <add>, %2, %cst [1] : vector<8x32xf32> to vector<8xf32>
    %4 = vector.shape_cast %3 : vector<8xf32> to vector<8x1xf32>
    %5 = math.sqrt %4 : vector<8x1xf32>
    %cst_2 = arith.constant 0.176776692 : f32
    %6 = vector.broadcast %cst_2 : f32 to vector<8x1xf32>
    %7 = arith.mulf %5, %6 : vector<8x1xf32>
    %cst_3 = arith.constant 9.99999993E-9 : f32
    %8 = vector.broadcast %cst_3 : f32 to vector<8x1xf32>
    %9 = arith.addf %7, %8 : vector<8x1xf32>
    %10 = tpu.reciprocal %9 : vector<8x1xf32> -> vector<8x1xf32>
    %11 = vector.broadcast %10 : vector<8x1xf32> to vector<8x32xf32>
    %12 = arith.mulf %1, %11 : vector<8x32xf32>
    %c0_4 = arith.constant 0 : index
    %c0_5 = arith.constant 0 : index
    %13 = vector.load %arg2[%c0_4, %c0_5] : memref<32x96xf32, #tpu.memory_space<vmem>>, vector<32x96xf32>
    %cst_6 = arith.constant dense<0.000000e+00> : vector<8x96xf32>
    %14 = tpu.matmul %12, %13, %cst_6 {dimension_numbers = #tpu.dot_dimension_numbers<[1], [0], [0], [1], [0, 0, 1, 1], [], []>} : vector<8x32xf32>, vector<32x96xf32>, vector<8x96xf32> -> vector<8x96xf32>
    %15 = tpu.iota {dimensions = array<i32: 1>} : vector<1x8x8xi32>
    %16 = tpu.iota {dimensions = array<i32: 2>} : vector<1x8x8xi32>
    %17 = arith.cmpi sgt, %16, %15 : vector<1x8x8xi32>
    %18 = vector.extract_strided_slice %14 {offsets = [0, 0], sizes = [8, 8], strides = [1, 1]} : vector<8x96xf32> to vector<8x8xf32>
    %19 = vector.shape_cast %18 : vector<8x8xf32> to vector<1x8x8xf32>
    %20 = vector.extract_strided_slice %14 {offsets = [0, 32], sizes = [8, 8], strides = [1, 1]} : vector<8x96xf32> to vector<8x8xf32>
    %21 = vector.shape_cast %20 : vector<8x8xf32> to vector<1x8x8xf32>
    %22 = vector.extract_strided_slice %14 {offsets = [0, 64], sizes = [8, 8], strides = [1, 1]} : vector<8x96xf32> to vector<8x8xf32>
    %23 = vector.shape_cast %22 : vector<8x8xf32> to vector<1x8x8xf32>
    "tpu.trace_start"() <{level = 10 : i32, message = "bqd,bkd->bqk"}> : () -> ()
    %cst_7 = arith.constant dense<0.000000e+00> : vector<1x8x8xf32>
    %24 = tpu.matmul %19, %21, %cst_7 {dimension_numbers = #tpu.dot_dimension_numbers<[2], [2], [1], [1], [0, 0, 0, 1, 1, 1], [0], [0]>} : vector<1x8x8xf32>, vector<1x8x8xf32>, vector<1x8x8xf32> -> vector<1x8x8xf32>
    %cst_8 = arith.constant -1.000000e+30 : f32
    "tpu.trace_stop"() : () -> ()
    %25 = vector.broadcast %cst_8 : f32 to vector<1x8x8xf32>
    %26 = arith.select %17, %25, %24 : vector<1x8x8xi1>, vector<1x8x8xf32>
    %cst_9 = arith.constant dense<0xFF800000> : vector<1x8xf32>
    %27 = vector.multi_reduction <maximumf>, %26, %cst_9 [2] : vector<1x8x8xf32> to vector<1x8xf32>
    %28 = vector.shape_cast %27 : vector<1x8xf32> to vector<1x8x1xf32>
    %29 = vector.broadcast %28 : vector<1x8x1xf32> to vector<1x8x8xf32>
    %30 = arith.subf %26, %29 : vector<1x8x8xf32>
    %31 = math.exp %30 : vector<1x8x8xf32>
    %cst_10 = arith.constant dense<0.000000e+00> : vector<1x8xf32>
    %32 = vector.multi_reduction <add>, %31, %cst_10 [2] : vector<1x8x8xf32> to vector<1x8xf32>
    %33 = vector.shape_cast %32 : vector<1x8xf32> to vector<1x8x1xf32>
    %34 = tpu.reciprocal %33 : vector<1x8x1xf32> -> vector<1x8x1xf32>
    %35 = vector.broadcast %34 : vector<1x8x1xf32> to vector<1x8x8xf32>
    %36 = arith.mulf %31, %35 : vector<1x8x8xf32>
    "tpu.trace_start"() <{level = 10 : i32, message = "bqk,bkd->bqd"}> : () -> ()
    %cst_11 = arith.constant dense<0.000000e+00> : vector<1x8x8xf32>
    %37 = tpu.matmul %36, %23, %cst_11 {dimension_numbers = #tpu.dot_dimension_numbers<[2], [1], [1], [2], [0, 0, 0, 1, 1, 2], [0], [0]>} : vector<1x8x8xf32>, vector<1x8x8xf32>, vector<1x8x8xf32> -> vector<1x8x8xf32>
    "tpu.trace_stop"() : () -> ()
    %38 = vector.shape_cast %37 : vector<1x8x8xf32> to vector<8x8xf32>
    %c0_12 = arith.constant 0 : index
    %c0_13 = arith.constant 0 : index
    %39 = vector.load %arg9[%c0_12, %c0_13] : memref<8x32xf32, #tpu.memory_space<vmem>>, vector<8x8xf32>
    tpu.vector_store %arg9[%c0_12, %c0_13], %38 {strides = array<i32>} : memref<8x32xf32, #tpu.memory_space<vmem>>, vector<8x8xf32>,
    %40 = vector.extract_strided_slice %14 {offsets = [0, 8], sizes = [8, 8], strides = [1, 1]} : vector<8x96xf32> to vector<8x8xf32>
    %41 = vector.shape_cast %40 : vector<8x8xf32> to vector<1x8x8xf32>
    %42 = vector.extract_strided_slice %14 {offsets = [0, 40], sizes = [8, 8], strides = [1, 1]} : vector<8x96xf32> to vector<8x8xf32>
    %43 = vector.shape_cast %42 : vector<8x8xf32> to vector<1x8x8xf32>
    %44 = vector.extract_strided_slice %14 {offsets = [0, 72], sizes = [8, 8], strides = [1, 1]} : vector<8x96xf32> to vector<8x8xf32>
    %45 = vector.shape_cast %44 : vector<8x8xf32> to vector<1x8x8xf32>
    "tpu.trace_start"() <{level = 10 : i32, message = "bqd,bkd->bqk"}> : () -> ()
    %cst_14 = arith.constant dense<0.000000e+00> : vector<1x8x8xf32>
    %46 = tpu.matmul %41, %43, %cst_14 {dimension_numbers = #tpu.dot_dimension_numbers<[2], [2], [1], [1], [0, 0, 0, 1, 1, 1], [0], [0]>} : vector<1x8x8xf32>, vector<1x8x8xf32>, vector<1x8x8xf32> -> vector<1x8x8xf32>
    %cst_15 = arith.constant -1.000000e+30 : f32
    "tpu.trace_stop"() : () -> ()
    %47 = vector.broadcast %cst_15 : f32 to vector<1x8x8xf32>
    %48 = arith.select %17, %47, %46 : vector<1x8x8xi1>, vector<1x8x8xf32>
    %cst_16 = arith.constant dense<0xFF800000> : vector<1x8xf32>
    %49 = vector.multi_reduction <maximumf>, %48, %cst_16 [2] : vector<1x8x8xf32> to vector<1x8xf32>
    %50 = vector.shape_cast %49 : vector<1x8xf32> to vector<1x8x1xf32>
    %51 = vector.broadcast %50 : vector<1x8x1xf32> to vector<1x8x8xf32>
    %52 = arith.subf %48, %51 : vector<1x8x8xf32>
    %53 = math.exp %52 : vector<1x8x8xf32>
    %cst_17 = arith.constant dense<0.000000e+00> : vector<1x8xf32>
    %54 = vector.multi_reduction <add>, %53, %cst_17 [2] : vector<1x8x8xf32> to vector<1x8xf32>
    %55 = vector.shape_cast %54 : vector<1x8xf32> to vector<1x8x1xf32>
    %56 = tpu.reciprocal %55 : vector<1x8x1xf32> -> vector<1x8x1xf32>
    %57 = vector.broadcast %56 : vector<1x8x1xf32> to vector<1x8x8xf32>
    %58 = arith.mulf %53, %57 : vector<1x8x8xf32>
    "tpu.trace_start"() <{level = 10 : i32, message = "bqk,bkd->bqd"}> : () -> ()
    %cst_18 = arith.constant dense<0.000000e+00> : vector<1x8x8xf32>
    %59 = tpu.matmul %58, %45, %cst_18 {dimension_numbers = #tpu.dot_dimension_numbers<[2], [1], [1], [2], [0, 0, 0, 1, 1, 2], [0], [0]>} : vector<1x8x8xf32>, vector<1x8x8xf32>, vector<1x8x8xf32> -> vector<1x8x8xf32>
    "tpu.trace_stop"() : () -> ()
    %60 = vector.shape_cast %59 : vector<1x8x8xf32> to vector<8x8xf32>
    %c0_19 = arith.constant 0 : index
    %c8 = arith.constant 8 : index
    %61 = vector.load %arg9[%c0_19, %c8] : memref<8x32xf32, #tpu.memory_space<vmem>>, vector<8x8xf32>
    tpu.vector_store %arg9[%c0_19, %c8], %60 {strides = array<i32>} : memref<8x32xf32, #tpu.memory_space<vmem>>, vector<8x8xf32>,
    %62 = vector.extract_strided_slice %14 {offsets = [0, 16], sizes = [8, 8], strides = [1, 1]} : vector<8x96xf32> to vector<8x8xf32>
    %63 = vector.shape_cast %62 : vector<8x8xf32> to vector<1x8x8xf32>
    %64 = vector.extract_strided_slice %14 {offsets = [0, 48], sizes = [8, 8], strides = [1, 1]} : vector<8x96xf32> to vector<8x8xf32>
    %65 = vector.shape_cast %64 : vector<8x8xf32> to vector<1x8x8xf32>
    %66 = vector.extract_strided_slice %14 {offsets = [0, 80], sizes = [8, 8], strides = [1, 1]} : vector<8x96xf32> to vector<8x8xf32>
    %67 = vector.shape_cast %66 : vector<8x8xf32> to vector<1x8x8xf32>
    "tpu.trace_start"() <{level = 10 : i32, message = "bqd,bkd->bqk"}> : () -> ()
    %cst_20 = arith.constant dense<0.000000e+00> : vector<1x8x8xf32>
    %68 = tpu.matmul %63, %65, %cst_20 {dimension_numbers = #tpu.dot_dimension_numbers<[2], [2], [1], [1], [0, 0, 0, 1, 1, 1], [0], [0]>} : vector<1x8x8xf32>, vector<1x8x8xf32>, vector<1x8x8xf32> -> vector<1x8x8xf32>
    %cst_21 = arith.constant -1.000000e+30 : f32
    "tpu.trace_stop"() : () -> ()
    %69 = vector.broadcast %cst_21 : f32 to vector<1x8x8xf32>
    %70 = arith.select %17, %69, %68 : vector<1x8x8xi1>, vector<1x8x8xf32>
    %cst_22 = arith.constant dense<0xFF800000> : vector<1x8xf32>
    %71 = vector.multi_reduction <maximumf>, %70, %cst_22 [2] : vector<1x8x8xf32> to vector<1x8xf32>
    %72 = vector.shape_cast %71 : vector<1x8xf32> to vector<1x8x1xf32>
    %73 = vector.broadcast %72 : vector<1x8x1xf32> to vector<1x8x8xf32>
    %74 = arith.subf %70, %73 : vector<1x8x8xf32>
    %75 = math.exp %74 : vector<1x8x8xf32>
    %cst_23 = arith.constant dense<0.000000e+00> : vector<1x8xf32>
    %76 = vector.multi_reduction <add>, %75, %cst_23 [2] : vector<1x8x8xf32> to vector<1x8xf32>
    %77 = vector.shape_cast %76 : vector<1x8xf32> to vector<1x8x1xf32>
    %78 = tpu.reciprocal %77 : vector<1x8x1xf32> -> vector<1x8x1xf32>
    %79 = vector.broadcast %78 : vector<1x8x1xf32> to vector<1x8x8xf32>
    %80 = arith.mulf %75, %79 : vector<1x8x8xf32>
    "tpu.trace_start"() <{level = 10 : i32, message = "bqk,bkd->bqd"}> : () -> ()
    %cst_24 = arith.constant dense<0.000000e+00> : vector<1x8x8xf32>
    %81 = tpu.matmul %80, %67, %cst_24 {dimension_numbers = #tpu.dot_dimension_numbers<[2], [1], [1], [2], [0, 0, 0, 1, 1, 2], [0], [0]>} : vector<1x8x8xf32>, vector<1x8x8xf32>, vector<1x8x8xf32> -> vector<1x8x8xf32>
    "tpu.trace_stop"() : () -> ()
    %82 = vector.shape_cast %81 : vector<1x8x8xf32> to vector<8x8xf32>
    %c0_25 = arith.constant 0 : index
    %c16 = arith.constant 16 : index
    %83 = vector.load %arg9[%c0_25, %c16] : memref<8x32xf32, #tpu.memory_space<vmem>>, vector<8x8xf32>
    tpu.vector_store %arg9[%c0_25, %c16], %82 {strides = array<i32>} : memref<8x32xf32, #tpu.memory_space<vmem>>, vector<8x8xf32>,
    %84 = vector.extract_strided_slice %14 {offsets = [0, 24], sizes = [8, 8], strides = [1, 1]} : vector<8x96xf32> to vector<8x8xf32>
    %85 = vector.shape_cast %84 : vector<8x8xf32> to vector<1x8x8xf32>
    %86 = vector.extract_strided_slice %14 {offsets = [0, 56], sizes = [8, 8], strides = [1, 1]} : vector<8x96xf32> to vector<8x8xf32>
    %87 = vector.shape_cast %86 : vector<8x8xf32> to vector<1x8x8xf32>
    %88 = vector.extract_strided_slice %14 {offsets = [0, 88], sizes = [8, 8], strides = [1, 1]} : vector<8x96xf32> to vector<8x8xf32>
    %89 = vector.shape_cast %88 : vector<8x8xf32> to vector<1x8x8xf32>
    "tpu.trace_start"() <{level = 10 : i32, message = "bqd,bkd->bqk"}> : () -> ()
    %cst_26 = arith.constant dense<0.000000e+00> : vector<1x8x8xf32>
    %90 = tpu.matmul %85, %87, %cst_26 {dimension_numbers = #tpu.dot_dimension_numbers<[2], [2], [1], [1], [0, 0, 0, 1, 1, 1], [0], [0]>} : vector<1x8x8xf32>, vector<1x8x8xf32>, vector<1x8x8xf32> -> vector<1x8x8xf32>
    %cst_27 = arith.constant -1.000000e+30 : f32
    "tpu.trace_stop"() : () -> ()
    %91 = vector.broadcast %cst_27 : f32 to vector<1x8x8xf32>
    %92 = arith.select %17, %91, %90 : vector<1x8x8xi1>, vector<1x8x8xf32>
    %cst_28 = arith.constant dense<0xFF800000> : vector<1x8xf32>
    %93 = vector.multi_reduction <maximumf>, %92, %cst_28 [2] : vector<1x8x8xf32> to vector<1x8xf32>
    %94 = vector.shape_cast %93 : vector<1x8xf32> to vector<1x8x1xf32>
    %95 = vector.broadcast %94 : vector<1x8x1xf32> to vector<1x8x8xf32>
    %96 = arith.subf %92, %95 : vector<1x8x8xf32>
    %97 = math.exp %96 : vector<1x8x8xf32>
    %cst_29 = arith.constant dense<0.000000e+00> : vector<1x8xf32>
    %98 = vector.multi_reduction <add>, %97, %cst_29 [2] : vector<1x8x8xf32> to vector<1x8xf32>
    %99 = vector.shape_cast %98 : vector<1x8xf32> to vector<1x8x1xf32>
    %100 = tpu.reciprocal %99 : vector<1x8x1xf32> -> vector<1x8x1xf32>
    %101 = vector.broadcast %100 : vector<1x8x1xf32> to vector<1x8x8xf32>
    %102 = arith.mulf %97, %101 : vector<1x8x8xf32>
    "tpu.trace_start"() <{level = 10 : i32, message = "bqk,bkd->bqd"}> : () -> ()
    %cst_30 = arith.constant dense<0.000000e+00> : vector<1x8x8xf32>
    %103 = tpu.matmul %102, %89, %cst_30 {dimension_numbers = #tpu.dot_dimension_numbers<[2], [1], [1], [2], [0, 0, 0, 1, 1, 2], [0], [0]>} : vector<1x8x8xf32>, vector<1x8x8xf32>, vector<1x8x8xf32> -> vector<1x8x8xf32>
    "tpu.trace_stop"() : () -> ()
    %104 = vector.shape_cast %103 : vector<1x8x8xf32> to vector<8x8xf32>
    %c0_31 = arith.constant 0 : index
    %c24 = arith.constant 24 : index
    %105 = vector.load %arg9[%c0_31, %c24] : memref<8x32xf32, #tpu.memory_space<vmem>>, vector<8x8xf32>
    tpu.vector_store %arg9[%c0_31, %c24], %104 {strides = array<i32>} : memref<8x32xf32, #tpu.memory_space<vmem>>, vector<8x8xf32>,
    %c0_32 = arith.constant 0 : index
    %c0_33 = arith.constant 0 : index
    %106 = vector.load %arg9[%c0_32, %c0_33] : memref<8x32xf32, #tpu.memory_space<vmem>>, vector<8x32xf32>
    %c0_34 = arith.constant 0 : index
    %c0_35 = arith.constant 0 : index
    %107 = vector.load %arg3[%c0_34, %c0_35] : memref<32x32xf32, #tpu.memory_space<vmem>>, vector<32x32xf32>
    %cst_36 = arith.constant dense<0.000000e+00> : vector<8x32xf32>
    %108 = tpu.matmul %106, %107, %cst_36 {dimension_numbers = #tpu.dot_dimension_numbers<[1], [0], [0], [1], [0, 0, 1, 1], [], []>} : vector<8x32xf32>, vector<32x32xf32>, vector<8x32xf32> -> vector<8x32xf32>
    %109 = arith.addf %1, %108 : vector<8x32xf32>
    %110 = arith.mulf %109, %109 : vector<8x32xf32>
    %cst_37 = arith.constant dense<0.000000e+00> : vector<8xf32>
    %111 = vector.multi_reduction <add>, %110, %cst_37 [1] : vector<8x32xf32> to vector<8xf32>
    %112 = vector.shape_cast %111 : vector<8xf32> to vector<8x1xf32>
    %113 = math.sqrt %112 : vector<8x1xf32>
    %cst_38 = arith.constant 0.176776692 : f32
    %114 = vector.broadcast %cst_38 : f32 to vector<8x1xf32>
    %115 = arith.mulf %113, %114 : vector<8x1xf32>
    %cst_39 = arith.constant 9.99999993E-9 : f32
    %116 = vector.broadcast %cst_39 : f32 to vector<8x1xf32>
    %117 = arith.addf %115, %116 : vector<8x1xf32>
    %118 = tpu.reciprocal %117 : vector<8x1xf32> -> vector<8x1xf32>
    %119 = vector.broadcast %118 : vector<8x1xf32> to vector<8x32xf32>
    %120 = arith.mulf %109, %119 : vector<8x32xf32>
    %c0_40 = arith.constant 0 : index
    %c0_41 = arith.constant 0 : index
    %121 = vector.load %arg4[%c0_40, %c0_41] : memref<32x128xf32, #tpu.memory_space<vmem>>, vector<32x128xf32>
    %cst_42 = arith.constant dense<0.000000e+00> : vector<8x128xf32>
    %122 = tpu.matmul %120, %121, %cst_42 {dimension_numbers = #tpu.dot_dimension_numbers<[1], [0], [0], [1], [0, 0, 1, 1], [], []>} : vector<8x32xf32>, vector<32x128xf32>, vector<8x128xf32> -> vector<8x128xf32>
    %c0_43 = arith.constant 0 : index
    %c0_44 = arith.constant 0 : index
    %123 = vector.load %arg5[%c0_43, %c0_44] : memref<1x128xf32, #tpu.memory_space<vmem>>, vector<1x128xf32>
    %124 = vector.shape_cast %123 : vector<1x128xf32> to vector<128xf32>
    %125 = vector.shape_cast %124 : vector<128xf32> to vector<1x128xf32>
    %126 = vector.broadcast %125 : vector<1x128xf32> to vector<8x128xf32>
    %127 = arith.addf %122, %126 : vector<8x128xf32>
    %cst_45 = arith.constant 5.000000e-01 : f32
    %128 = vector.broadcast %cst_45 : f32 to vector<8x128xf32>
    %129 = arith.mulf %128, %127 : vector<8x128xf32>
    %cst_46 = arith.constant 0.707106769 : f32
    %130 = vector.broadcast %cst_46 : f32 to vector<8x128xf32>
    %131 = arith.mulf %127, %130 : vector<8x128xf32>
    %132 = math.erf %131 : vector<8x128xf32>
    %cst_47 = arith.constant 1.000000e+00 : f32
    %133 = vector.broadcast %cst_47 : f32 to vector<8x128xf32>
    %134 = arith.addf %133, %132 : vector<8x128xf32>
    %135 = arith.mulf %129, %134 : vector<8x128xf32>
    %c0_48 = arith.constant 0 : index
    %c0_49 = arith.constant 0 : index
    %136 = vector.load %arg6[%c0_48, %c0_49] : memref<128x32xf32, #tpu.memory_space<vmem>>, vector<128x32xf32>
    %cst_50 = arith.constant dense<0.000000e+00> : vector<8x32xf32>
    %137 = tpu.matmul %135, %136, %cst_50 {dimension_numbers = #tpu.dot_dimension_numbers<[1], [0], [0], [1], [0, 0, 1, 1], [], []>} : vector<8x128xf32>, vector<128x32xf32>, vector<8x32xf32> -> vector<8x32xf32>
    %c0_51 = arith.constant 0 : index
    %c0_52 = arith.constant 0 : index
    %138 = vector.load %arg7[%c0_51, %c0_52] : memref<1x32xf32, #tpu.memory_space<vmem>>, vector<1x32xf32>
    %139 = vector.shape_cast %138 : vector<1x32xf32> to vector<32xf32>
    %140 = vector.shape_cast %139 : vector<32xf32> to vector<1x32xf32>
    %141 = vector.broadcast %140 : vector<1x32xf32> to vector<8x32xf32>
    %142 = arith.addf %137, %141 : vector<8x32xf32>
    %143 = arith.addf %109, %142 : vector<8x32xf32>
    %144 = vector.shape_cast %143 : vector<8x32xf32> to vector<1x8x32xf32>
    %c0_53 = arith.constant 0 : index
    %c0_54 = arith.constant 0 : index
    %c0_55 = arith.constant 0 : index
    %145 = vector.load %arg8[%c0_53, %c0_54, %c0_55] : memref<1x8x32xf32, #tpu.memory_space<vmem>>, vector<1x8x32xf32>
    tpu.vector_store %arg8[%c0_53, %c0_54, %c0_55], %144 {strides = array<i32>} : memref<1x8x32xf32, #tpu.memory_space<vmem>>, vector<1x8x32xf32>,
    return
  }
  func.func @transform_0(%arg0: i32) -> (i32, i32, i32) {
    %c0_i32 = arith.constant 0 : i32
    %c0_i32_0 = arith.constant 0 : i32
    %c0_i32_1 = arith.constant 0 : i32
    return %arg0, %c0_i32, %c0_i32_0 : i32, i32, i32
  }
  func.func @transform_1(%arg0: i32) -> (i32, i32) {
    %c0_i32 = arith.constant 0 : i32
    %c0_i32_0 = arith.constant 0 : i32
    %c0_i32_1 = arith.constant 0 : i32
    return %c0_i32, %c0_i32_0 : i32, i32
  }
  func.func @transform_2(%arg0: i32) -> (i32, i32) {
    %c0_i32 = arith.constant 0 : i32
    %c0_i32_0 = arith.constant 0 : i32
    %c0_i32_1 = arith.constant 0 : i32
    return %c0_i32, %c0_i32_0 : i32, i32
  }
  func.func @transform_3(%arg0: i32) -> (i32, i32) {
    %c0_i32 = arith.constant 0 : i32
    %c0_i32_0 = arith.constant 0 : i32
    %c0_i32_1 = arith.constant 0 : i32
    return %c0_i32, %c0_i32_0 : i32, i32
  }
  func.func @transform_4(%arg0: i32) -> (i32, i32) {
    %c0_i32 = arith.constant 0 : i32
    %c0_i32_0 = arith.constant 0 : i32
    %c0_i32_1 = arith.constant 0 : i32
    return %c0_i32, %c0_i32_0 : i32, i32
  }
  func.func @transform_5(%arg0: i32) -> (i32, i32) {
    %c0_i32 = arith.constant 0 : i32
    %c0_i32_0 = arith.constant 0 : i32
    %c0_i32_1 = arith.constant 0 : i32
    return %c0_i32, %c0_i32_0 : i32, i32
  }
  func.func @transform_6(%arg0: i32) -> (i32, i32) {
    %c0_i32 = arith.constant 0 : i32
    %c0_i32_0 = arith.constant 0 : i32
    %c0_i32_1 = arith.constant 0 : i32
    return %c0_i32, %c0_i32_0 : i32, i32
  }
  func.func @transform_7(%arg0: i32) -> (i32, i32, i32) {
    %c0_i32 = arith.constant 0 : i32
    %c0_i32_0 = arith.constant 0 : i32
    %c0_i32_1 = arith.constant 0 : i32
    return %arg0, %c0_i32, %c0_i32_0 : i32, i32, i32
  }
}

module attributes {stable_mosaic.version = 11 : i64} {
  func.func @subblock_kernel(%arg0: i32, %arg1: memref<1x8x32xf32, #tpu.memory_space<vmem>>, %arg2: memref<32x96xf32, #tpu.memory_space<vmem>>, %arg3: memref<32x32xf32, #tpu.memory_space<vmem>>, %arg4: memref<32x128xf32, #tpu.memory_space<vmem>>, %arg5: memref<1x128xf32, #tpu.memory_space<vmem>>, %arg6: memref<128x32xf32, #tpu.memory_space<vmem>>, %arg7: memref<1x32xf32, #tpu.memory_space<vmem>>, %arg8: memref<1x8x32xf32, #tpu.memory_space<vmem>>, %arg9: memref<8x32xf32, #tpu.memory_space<vmem>>) attributes {dimension_semantics = [#tpu.dimension_semantics<parallel>], iteration_bounds = array<i64: 2>, scalar_prefetch = 0 : i64, scratch_operands = 1 : i64, tpu.core_type = #tpu.core_type<tc>, window_params = [{transform_indices = @transform_0, window_bounds = array<i64: 1, 8, 32>}, {pipeline_mode = #tpu.pipeline_mode<synchronous>, transform_indices = @transform_1, window_bounds = array<i64: 32, 96>}, {pipeline_mode = #tpu.pipeline_mode<synchronous>, transform_indices = @transform_2, window_bounds = array<i64: 32, 32>}, {pipeline_mode = #tpu.pipeline_mode<synchronous>, transform_indices = @transform_3, window_bounds = array<i64: 32, 128>}, {pipeline_mode = #tpu.pipeline_mode<synchronous>, transform_indices = @transform_4, window_bounds = array<i64: 1, 128>}, {pipeline_mode = #tpu.pipeline_mode<synchronous>, transform_indices = @transform_5, window_bounds = array<i64: 128, 32>}, {pipeline_mode = #tpu.pipeline_mode<synchronous>, transform_indices = @transform_6, window_bounds = array<i64: 1, 32>}, {transform_indices = @transform_7, window_bounds = array<i64: 1, 8, 32>}]} {
    %c0 = arith.constant 0 : index
    %c0_0 = arith.constant 0 : index
    %c0_1 = arith.constant 0 : index
    %0 = vector.load %arg1[%c0, %c0_0, %c0_1] : memref<1x8x32xf32, #tpu.memory_space<vmem>>, vector<1x8x32xf32>
    %1 = vector.shape_cast %0 : vector<1x8x32xf32> to vector<8x32xf32>
    %2 = arith.mulf %1, %1 : vector<8x32xf32>
    %cst = arith.constant dense<0.000000e+00> : vector<8xf32>
    %3 = vector.multi_reduction <add>, %2, %cst [1] : vector<8x32xf32> to vector<8xf32>
    %4 = vector.shape_cast %3 : vector<8xf32> to vector<8x1xf32>
    %5 = math.sqrt %4 : vector<8x1xf32>
    %cst_2 = arith.constant 0.176776692 : f32
    %6 = vector.broadcast %cst_2 : f32 to vector<8x1xf32>
    %7 = arith.mulf %5, %6 : vector<8x1xf32>
    %cst_3 = arith.constant 9.99999993E-9 : f32
    %8 = vector.broadcast %cst_3 : f32 to vector<8x1xf32>
    %9 = arith.addf %7, %8 : vector<8x1xf32>
    %10 = tpu.reciprocal %9 : vector<8x1xf32> -> vector<8x1xf32>
    %11 = vector.broadcast %10 : vector<8x1xf32> to vector<8x32xf32>
    %12 = arith.mulf %1, %11 : vector<8x32xf32>
    %c0_4 = arith.constant 0 : index
    %c0_5 = arith.constant 0 : index
    %13 = vector.load %arg2[%c0_4, %c0_5] : memref<32x96xf32, #tpu.memory_space<vmem>>, vector<32x96xf32>
    %cst_6 = arith.constant dense<0.000000e+00> : vector<8x96xf32>
    %14 = tpu.matmul %12, %13, %cst_6 {dimension_numbers = #tpu.dot_dimension_numbers<[1], [0], [0], [1], [0, 0, 1, 1], [], []>} : vector<8x32xf32>, vector<32x96xf32>, vector<8x96xf32> -> vector<8x96xf32>
    %15 = tpu.iota {dimensions = array<i32: 1>} : vector<1x8x8xi32>
    %16 = tpu.iota {dimensions = array<i32: 2>} : vector<1x8x8xi32>
    %17 = arith.cmpi sgt, %16, %15 : vector<1x8x8xi32>
    %18 = vector.extract_strided_slice %14 {offsets = [0, 0], sizes = [8, 8], strides = [1, 1]} : vector<8x96xf32> to vector<8x8xf32>
    %19 = vector.shape_cast %18 : vector<8x8xf32> to vector<1x8x8xf32>
    %20 = vector.extract_strided_slice %14 {offsets = [0, 32], sizes = [8, 8], strides = [1, 1]} : vector<8x96xf32> to vector<8x8xf32>
    %21 = vector.shape_cast %20 : vector<8x8xf32> to vector<1x8x8xf32>
    %22 = vector.extract_strided_slice %14 {offsets = [0, 64], sizes = [8, 8], strides = [1, 1]} : vector<8x96xf32> to vector<8x8xf32>
    %23 = vector.shape_cast %22 : vector<8x8xf32> to vector<1x8x8xf32>
    "tpu.trace_start"() <{level = 10 : i32, message = "bqd,bkd->bqk"}> : () -> ()
    %cst_7 = arith.constant dense<0.000000e+00> : vector<1x8x8xf32>
    %24 = tpu.matmul %19, %21, %cst_7 {dimension_numbers = #tpu.dot_dimension_numbers<[2], [2], [1], [1], [0, 0, 0, 1, 1, 1], [0], [0]>} : vector<1x8x8xf32>, vector<1x8x8xf32>, vector<1x8x8xf32> -> vector<1x8x8xf32>
    %cst_8 = arith.constant -1.000000e+30 : f32
    "tpu.trace_stop"() : () -> ()
    %25 = vector.broadcast %cst_8 : f32 to vector<1x8x8xf32>
    %26 = arith.select %17, %25, %24 : vector<1x8x8xi1>, vector<1x8x8xf32>
    %cst_9 = arith.constant dense<0xFF800000> : vector<1x8xf32>
    %27 = vector.multi_reduction <maximumf>, %26, %cst_9 [2] : vector<1x8x8xf32> to vector<1x8xf32>
    %28 = vector.shape_cast %27 : vector<1x8xf32> to vector<1x8x1xf32>
    %29 = vector.broadcast %28 : vector<1x8x1xf32> to vector<1x8x8xf32>
    %30 = arith.subf %26, %29 : vector<1x8x8xf32>
    %31 = math.exp %30 : vector<1x8x8xf32>
    %cst_10 = arith.constant dense<0.000000e+00> : vector<1x8xf32>
    %32 = vector.multi_reduction <add>, %31, %cst_10 [2] : vector<1x8x8xf32> to vector<1x8xf32>
    %33 = vector.shape_cast %32 : vector<1x8xf32> to vector<1x8x1xf32>
    %34 = tpu.reciprocal %33 : vector<1x8x1xf32> -> vector<1x8x1xf32>
    %35 = vector.broadcast %34 : vector<1x8x1xf32> to vector<1x8x8xf32>
    %36 = arith.mulf %31, %35 : vector<1x8x8xf32>
    "tpu.trace_start"() <{level = 10 : i32, message = "bqk,bkd->bqd"}> : () -> ()
    %cst_11 = arith.constant dense<0.000000e+00> : vector<1x8x8xf32>
    %37 = tpu.matmul %36, %23, %cst_11 {dimension_numbers = #tpu.dot_dimension_numbers<[2], [1], [1], [2], [0, 0, 0, 1, 1, 2], [0], [0]>} : vector<1x8x8xf32>, vector<1x8x8xf32>, vector<1x8x8xf32> -> vector<1x8x8xf32>
    "tpu.trace_stop"() : () -> ()
    %38 = vector.shape_cast %37 : vector<1x8x8xf32> to vector<8x8xf32>
    %c0_12 = arith.constant 0 : index
    %c0_13 = arith.constant 0 : index
    %39 = vector.load %arg9[%c0_12, %c0_13] : memref<8x32xf32, #tpu.memory_space<vmem>>, vector<8x8xf32>
    tpu.vector_store %arg9[%c0_12, %c0_13], %38 {strides = array<i32>} : memref<8x32xf32, #tpu.memory_space<vmem>>, vector<8x8xf32>,
    %40 = vector.extract_strided_slice %14 {offsets = [0, 8], sizes = [8, 8], strides = [1, 1]} : vector<8x96xf32> to vector<8x8xf32>
    %41 = vector.shape_cast %40 : vector<8x8xf32> to vector<1x8x8xf32>
    %42 = vector.extract_strided_slice %14 {offsets = [0, 40], sizes = [8, 8], strides = [1, 1]} : vector<8x96xf32> to vector<8x8xf32>
    %43 = vector.shape_cast %42 : vector<8x8xf32> to vector<1x8x8xf32>
    %44 = vector.extract_strided_slice %14 {offsets = [0, 72], sizes = [8, 8], strides = [1, 1]} : vector<8x96xf32> to vector<8x8xf32>
    %45 = vector.shape_cast %44 : vector<8x8xf32> to vector<1x8x8xf32>
    "tpu.trace_start"() <{level = 10 : i32, message = "bqd,bkd->bqk"}> : () -> ()
    %cst_14 = arith.constant dense<0.000000e+00> : vector<1x8x8xf32>
    %46 = tpu.matmul %41, %43, %cst_14 {dimension_numbers = #tpu.dot_dimension_numbers<[2], [2], [1], [1], [0, 0, 0, 1, 1, 1], [0], [0]>} : vector<1x8x8xf32>, vector<1x8x8xf32>, vector<1x8x8xf32> -> vector<1x8x8xf32>
    %cst_15 = arith.constant -1.000000e+30 : f32
    "tpu.trace_stop"() : () -> ()
    %47 = vector.broadcast %cst_15 : f32 to vector<1x8x8xf32>
    %48 = arith.select %17, %47, %46 : vector<1x8x8xi1>, vector<1x8x8xf32>
    %cst_16 = arith.constant dense<0xFF800000> : vector<1x8xf32>
    %49 = vector.multi_reduction <maximumf>, %48, %cst_16 [2] : vector<1x8x8xf32> to vector<1x8xf32>
    %50 = vector.shape_cast %49 : vector<1x8xf32> to vector<1x8x1xf32>
    %51 = vector.broadcast %50 : vector<1x8x1xf32> to vector<1x8x8xf32>
    %52 = arith.subf %48, %51 : vector<1x8x8xf32>
    %53 = math.exp %52 : vector<1x8x8xf32>
    %cst_17 = arith.constant dense<0.000000e+00> : vector<1x8xf32>
    %54 = vector.multi_reduction <add>, %53, %cst_17 [2] : vector<1x8x8xf32> to vector<1x8xf32>
    %55 = vector.shape_cast %54 : vector<1x8xf32> to vector<1x8x1xf32>
    %56 = tpu.reciprocal %55 : vector<1x8x1xf32> -> vector<1x8x1xf32>
    %57 = vector.broadcast %56 : vector<1x8x1xf32> to vector<1x8x8xf32>
    %58 = arith.mulf %53, %57 : vector<1x8x8xf32>
    "tpu.trace_start"() <{level = 10 : i32, message = "bqk,bkd->bqd"}> : () -> ()
    %cst_18 = arith.constant dense<0.000000e+00> : vector<1x8x8xf32>
    %59 = tpu.matmul %58, %45, %cst_18 {dimension_numbers = #tpu.dot_dimension_numbers<[2], [1], [1], [2], [0, 0, 0, 1, 1, 2], [0], [0]>} : vector<1x8x8xf32>, vector<1x8x8xf32>, vector<1x8x8xf32> -> vector<1x8x8xf32>
    "tpu.trace_stop"() : () -> ()
    %60 = vector.shape_cast %59 : vector<1x8x8xf32> to vector<8x8xf32>
    %c0_19 = arith.constant 0 : index
    %c8 = arith.constant 8 : index
    %61 = vector.load %arg9[%c0_19, %c8] : memref<8x32xf32, #tpu.memory_space<vmem>>, vector<8x8xf32>
    tpu.vector_store %arg9[%c0_19, %c8], %60 {strides = array<i32>} : memref<8x32xf32, #tpu.memory_space<vmem>>, vector<8x8xf32>,
    %62 = vector.extract_strided_slice %14 {offsets = [0, 16], sizes = [8, 8], strides = [1, 1]} : vector<8x96xf32> to vector<8x8xf32>
    %63 = vector.shape_cast %62 : vector<8x8xf32> to vector<1x8x8xf32>
    %64 = vector.extract_strided_slice %14 {offsets = [0, 48], sizes = [8, 8], strides = [1, 1]} : vector<8x96xf32> to vector<8x8xf32>
    %65 = vector.shape_cast %64 : vector<8x8xf32> to vector<1x8x8xf32>
    %66 = vector.extract_strided_slice %14 {offsets = [0, 80], sizes = [8, 8], strides = [1, 1]} : vector<8x96xf32> to vector<8x8xf32>
    %67 = vector.shape_cast %66 : vector<8x8xf32> to vector<1x8x8xf32>
    "tpu.trace_start"() <{level = 10 : i32, message = "bqd,bkd->bqk"}> : () -> ()
    %cst_20 = arith.constant dense<0.000000e+00> : vector<1x8x8xf32>
    %68 = tpu.matmul %63, %65, %cst_20 {dimension_numbers = #tpu.dot_dimension_numbers<[2], [2], [1], [1], [0, 0, 0, 1, 1, 1], [0], [0]>} : vector<1x8x8xf32>, vector<1x8x8xf32>, vector<1x8x8xf32> -> vector<1x8x8xf32>
    %cst_21 = arith.constant -1.000000e+30 : f32
    "tpu.trace_stop"() : () -> ()
    %69 = vector.broadcast %cst_21 : f32 to vector<1x8x8xf32>
    %70 = arith.select %17, %69, %68 : vector<1x8x8xi1>, vector<1x8x8xf32>
    %cst_22 = arith.constant dense<0xFF800000> : vector<1x8xf32>
    %71 = vector.multi_reduction <maximumf>, %70, %cst_22 [2] : vector<1x8x8xf32> to vector<1x8xf32>
    %72 = vector.shape_cast %71 : vector<1x8xf32> to vector<1x8x1xf32>
    %73 = vector.broadcast %72 : vector<1x8x1xf32> to vector<1x8x8xf32>
    %74 = arith.subf %70, %73 : vector<1x8x8xf32>
    %75 = math.exp %74 : vector<1x8x8xf32>
    %cst_23 = arith.constant dense<0.000000e+00> : vector<1x8xf32>
    %76 = vector.multi_reduction <add>, %75, %cst_23 [2] : vector<1x8x8xf32> to vector<1x8xf32>
    %77 = vector.shape_cast %76 : vector<1x8xf32> to vector<1x8x1xf32>
    %78 = tpu.reciprocal %77 : vector<1x8x1xf32> -> vector<1x8x1xf32>
    %79 = vector.broadcast %78 : vector<1x8x1xf32> to vector<1x8x8xf32>
    %80 = arith.mulf %75, %79 : vector<1x8x8xf32>
    "tpu.trace_start"() <{level = 10 : i32, message = "bqk,bkd->bqd"}> : () -> ()
    %cst_24 = arith.constant dense<0.000000e+00> : vector<1x8x8xf32>
    %81 = tpu.matmul %80, %67, %cst_24 {dimension_numbers = #tpu.dot_dimension_numbers<[2], [1], [1], [2], [0, 0, 0, 1, 1, 2], [0], [0]>} : vector<1x8x8xf32>, vector<1x8x8xf32>, vector<1x8x8xf32> -> vector<1x8x8xf32>
    "tpu.trace_stop"() : () -> ()
    %82 = vector.shape_cast %81 : vector<1x8x8xf32> to vector<8x8xf32>
    %c0_25 = arith.constant 0 : index
    %c16 = arith.constant 16 : index
    %83 = vector.load %arg9[%c0_25, %c16] : memref<8x32xf32, #tpu.memory_space<vmem>>, vector<8x8xf32>
    tpu.vector_store %arg9[%c0_25, %c16], %82 {strides = array<i32>} : memref<8x32xf32, #tpu.memory_space<vmem>>, vector<8x8xf32>,
    %84 = vector.extract_strided_slice %14 {offsets = [0, 24], sizes = [8, 8], strides = [1, 1]} : vector<8x96xf32> to vector<8x8xf32>
    %85 = vector.shape_cast %84 : vector<8x8xf32> to vector<1x8x8xf32>
    %86 = vector.extract_strided_slice %14 {offsets = [0, 56], sizes = [8, 8], strides = [1, 1]} : vector<8x96xf32> to vector<8x8xf32>
    %87 = vector.shape_cast %86 : vector<8x8xf32> to vector<1x8x8xf32>
    %88 = vector.extract_strided_slice %14 {offsets = [0, 88], sizes = [8, 8], strides = [1, 1]} : vector<8x96xf32> to vector<8x8xf32>
    %89 = vector.shape_cast %88 : vector<8x8xf32> to vector<1x8x8xf32>
    "tpu.trace_start"() <{level = 10 : i32, message = "bqd,bkd->bqk"}> : () -> ()
    %cst_26 = arith.constant dense<0.000000e+00> : vector<1x8x8xf32>
    %90 = tpu.matmul %85, %87, %cst_26 {dimension_numbers = #tpu.dot_dimension_numbers<[2], [2], [1], [1], [0, 0, 0, 1, 1, 1], [0], [0]>} : vector<1x8x8xf32>, vector<1x8x8xf32>, vector<1x8x8xf32> -> vector<1x8x8xf32>
    %cst_27 = arith.constant -1.000000e+30 : f32
    "tpu.trace_stop"() : () -> ()
    %91 = vector.broadcast %cst_27 : f32 to vector<1x8x8xf32>
    %92 = arith.select %17, %91, %90 : vector<1x8x8xi1>, vector<1x8x8xf32>
    %cst_28 = arith.constant dense<0xFF800000> : vector<1x8xf32>
    %93 = vector.multi_reduction <maximumf>, %92, %cst_28 [2] : vector<1x8x8xf32> to vector<1x8xf32>
    %94 = vector.shape_cast %93 : vector<1x8xf32> to vector<1x8x1xf32>
    %95 = vector.broadcast %94 : vector<1x8x1xf32> to vector<1x8x8xf32>
    %96 = arith.subf %92, %95 : vector<1x8x8xf32>
    %97 = math.exp %96 : vector<1x8x8xf32>
    %cst_29 = arith.constant dense<0.000000e+00> : vector<1x8xf32>
    %98 = vector.multi_reduction <add>, %97, %cst_29 [2] : vector<1x8x8xf32> to vector<1x8xf32>
    %99 = vector.shape_cast %98 : vector<1x8xf32> to vector<1x8x1xf32>
    %100 = tpu.reciprocal %99 : vector<1x8x1xf32> -> vector<1x8x1xf32>
    %101 = vector.broadcast %100 : vector<1x8x1xf32> to vector<1x8x8xf32>
    %102 = arith.mulf %97, %101 : vector<1x8x8xf32>
    "tpu.trace_start"() <{level = 10 : i32, message = "bqk,bkd->bqd"}> : () -> ()
    %cst_30 = arith.constant dense<0.000000e+00> : vector<1x8x8xf32>
    %103 = tpu.matmul %102, %89, %cst_30 {dimension_numbers = #tpu.dot_dimension_numbers<[2], [1], [1], [2], [0, 0, 0, 1, 1, 2], [0], [0]>} : vector<1x8x8xf32>, vector<1x8x8xf32>, vector<1x8x8xf32> -> vector<1x8x8xf32>
    "tpu.trace_stop"() : () -> ()
    %104 = vector.shape_cast %103 : vector<1x8x8xf32> to vector<8x8xf32>
    %c0_31 = arith.constant 0 : index
    %c24 = arith.constant 24 : index
    %105 = vector.load %arg9[%c0_31, %c24] : memref<8x32xf32, #tpu.memory_space<vmem>>, vector<8x8xf32>
    tpu.vector_store %arg9[%c0_31, %c24], %104 {strides = array<i32>} : memref<8x32xf32, #tpu.memory_space<vmem>>, vector<8x8xf32>,
    %c0_32 = arith.constant 0 : index
    %c0_33 = arith.constant 0 : index
    %106 = vector.load %arg9[%c0_32, %c0_33] : memref<8x32xf32, #tpu.memory_space<vmem>>, vector<8x32xf32>
    %c0_34 = arith.constant 0 : index
    %c0_35 = arith.constant 0 : index
    %107 = vector.load %arg3[%c0_34, %c0_35] : memref<32x32xf32, #tpu.memory_space<vmem>>, vector<32x32xf32>
    %cst_36 = arith.constant dense<0.000000e+00> : vector<8x32xf32>
    %108 = tpu.matmul %106, %107, %cst_36 {dimension_numbers = #tpu.dot_dimension_numbers<[1], [0], [0], [1], [0, 0, 1, 1], [], []>} : vector<8x32xf32>, vector<32x32xf32>, vector<8x32xf32> -> vector<8x32xf32>
    %109 = arith.addf %1, %108 : vector<8x32xf32>
    %110 = arith.mulf %109, %109 : vector<8x32xf32>
    %cst_37 = arith.constant dense<0.000000e+00> : vector<8xf32>
    %111 = vector.multi_reduction <add>, %110, %cst_37 [1] : vector<8x32xf32> to vector<8xf32>
    %112 = vector.shape_cast %111 : vector<8xf32> to vector<8x1xf32>
    %113 = math.sqrt %112 : vector<8x1xf32>
    %cst_38 = arith.constant 0.176776692 : f32
    %114 = vector.broadcast %cst_38 : f32 to vector<8x1xf32>
    %115 = arith.mulf %113, %114 : vector<8x1xf32>
    %cst_39 = arith.constant 9.99999993E-9 : f32
    %116 = vector.broadcast %cst_39 : f32 to vector<8x1xf32>
    %117 = arith.addf %115, %116 : vector<8x1xf32>
    %118 = tpu.reciprocal %117 : vector<8x1xf32> -> vector<8x1xf32>
    %119 = vector.broadcast %118 : vector<8x1xf32> to vector<8x32xf32>
    %120 = arith.mulf %109, %119 : vector<8x32xf32>
    %c0_40 = arith.constant 0 : index
    %c0_41 = arith.constant 0 : index
    %121 = vector.load %arg4[%c0_40, %c0_41] : memref<32x128xf32, #tpu.memory_space<vmem>>, vector<32x128xf32>
    %cst_42 = arith.constant dense<0.000000e+00> : vector<8x128xf32>
    %122 = tpu.matmul %120, %121, %cst_42 {dimension_numbers = #tpu.dot_dimension_numbers<[1], [0], [0], [1], [0, 0, 1, 1], [], []>} : vector<8x32xf32>, vector<32x128xf32>, vector<8x128xf32> -> vector<8x128xf32>
    %c0_43 = arith.constant 0 : index
    %c0_44 = arith.constant 0 : index
    %123 = vector.load %arg5[%c0_43, %c0_44] : memref<1x128xf32, #tpu.memory_space<vmem>>, vector<1x128xf32>
    %124 = vector.shape_cast %123 : vector<1x128xf32> to vector<128xf32>
    %125 = vector.shape_cast %124 : vector<128xf32> to vector<1x128xf32>
    %126 = vector.broadcast %125 : vector<1x128xf32> to vector<8x128xf32>
    %127 = arith.addf %122, %126 : vector<8x128xf32>
    %cst_45 = arith.constant 5.000000e-01 : f32
    %128 = vector.broadcast %cst_45 : f32 to vector<8x128xf32>
    %129 = arith.mulf %128, %127 : vector<8x128xf32>
    %cst_46 = arith.constant 0.707106769 : f32
    %130 = vector.broadcast %cst_46 : f32 to vector<8x128xf32>
    %131 = arith.mulf %127, %130 : vector<8x128xf32>
    %132 = math.erf %131 : vector<8x128xf32>
    %cst_47 = arith.constant 1.000000e+00 : f32
    %133 = vector.broadcast %cst_47 : f32 to vector<8x128xf32>
    %134 = arith.addf %133, %132 : vector<8x128xf32>
    %135 = arith.mulf %129, %134 : vector<8x128xf32>
    %c0_48 = arith.constant 0 : index
    %c0_49 = arith.constant 0 : index
    %136 = vector.load %arg6[%c0_48, %c0_49] : memref<128x32xf32, #tpu.memory_space<vmem>>, vector<128x32xf32>
    %cst_50 = arith.constant dense<0.000000e+00> : vector<8x32xf32>
    %137 = tpu.matmul %135, %136, %cst_50 {dimension_numbers = #tpu.dot_dimension_numbers<[1], [0], [0], [1], [0, 0, 1, 1], [], []>} : vector<8x128xf32>, vector<128x32xf32>, vector<8x32xf32> -> vector<8x32xf32>
    %c0_51 = arith.constant 0 : index
    %c0_52 = arith.constant 0 : index
    %138 = vector.load %arg7[%c0_51, %c0_52] : memref<1x32xf32, #tpu.memory_space<vmem>>, vector<1x32xf32>
    %139 = vector.shape_cast %138 : vector<1x32xf32> to vector<32xf32>
    %140 = vector.shape_cast %139 : vector<32xf32> to vector<1x32xf32>
    %141 = vector.broadcast %140 : vector<1x32xf32> to vector<8x32xf32>
    %142 = arith.addf %137, %141 : vector<8x32xf32>
    %143 = arith.addf %109, %142 : vector<8x32xf32>
    %144 = vector.shape_cast %143 : vector<8x32xf32> to vector<1x8x32xf32>
    %c0_53 = arith.constant 0 : index
    %c0_54 = arith.constant 0 : index
    %c0_55 = arith.constant 0 : index
    %145 = vector.load %arg8[%c0_53, %c0_54, %c0_55] : memref<1x8x32xf32, #tpu.memory_space<vmem>>, vector<1x8x32xf32>
    tpu.vector_store %arg8[%c0_53, %c0_54, %c0_55], %144 {strides = array<i32>} : memref<1x8x32xf32, #tpu.memory_space<vmem>>, vector<1x8x32xf32>,
    return
  }
  func.func @transform_0(%arg0: i32) -> (i32, i32, i32) {
    %c0_i32 = arith.constant 0 : i32
    %c0_i32_0 = arith.constant 0 : i32
    %c0_i32_1 = arith.constant 0 : i32
    return %arg0, %c0_i32, %c0_i32_0 : i32, i32, i32
  }
  func.func @transform_1(%arg0: i32) -> (i32, i32) {
    %c0_i32 = arith.constant 0 : i32
    %c0_i32_0 = arith.constant 0 : i32
    %c0_i32_1 = arith.constant 0 : i32
    return %c0_i32, %c0_i32_0 : i32, i32
  }
  func.func @transform_2(%arg0: i32) -> (i32, i32) {
    %c0_i32 = arith.constant 0 : i32
    %c0_i32_0 = arith.constant 0 : i32
    %c0_i32_1 = arith.constant 0 : i32
    return %c0_i32, %c0_i32_0 : i32, i32
  }
  func.func @transform_3(%arg0: i32) -> (i32, i32) {
    %c0_i32 = arith.constant 0 : i32
    %c0_i32_0 = arith.constant 0 : i32
    %c0_i32_1 = arith.constant 0 : i32
    return %c0_i32, %c0_i32_0 : i32, i32
  }
  func.func @transform_4(%arg0: i32) -> (i32, i32) {
    %c0_i32 = arith.constant 0 : i32
    %c0_i32_0 = arith.constant 0 : i32
    %c0_i32_1 = arith.constant 0 : i32
    return %c0_i32, %c0_i32_0 : i32, i32
  }
  func.func @transform_5(%arg0: i32) -> (i32, i32) {
    %c0_i32 = arith.constant 0 : i32
    %c0_i32_0 = arith.constant 0 : i32
    %c0_i32_1 = arith.constant 0 : i32
    return %c0_i32, %c0_i32_0 : i32, i32
  }
  func.func @transform_6(%arg0: i32) -> (i32, i32) {
    %c0_i32 = arith.constant 0 : i32
    %c0_i32_0 = arith.constant 0 : i32
    %c0_i32_1 = arith.constant 0 : i32
    return %c0_i32, %c0_i32_0 : i32, i32
  }
  func.func @transform_7(%arg0: i32) -> (i32, i32, i32) {
    %c0_i32 = arith.constant 0 : i32
    %c0_i32_0 = arith.constant 0 : i32
    %c0_i32_1 = arith.constant 0 : i32
    return %arg0, %c0_i32, %c0_i32_0 : i32, i32, i32
  }
}

</mosaic_0001>

<bundles_post_ra>
// kernel: tpu_custom_call.1
= control target key start
LH: loop header
LB: loop body
LE: loop exit
PB: predicated region body
PF: predicated region fallthrough
CT: control target
= control target key end

     0   :  { %12 = vsyncpa [#allocation4], 0  ;;  %s2084_s0 = inlined_call_operand.vmem [shape: f32[2,8,32], index: 0, kind: input, shape index: {}]   ;;  %s2085_s1 = inlined_call_operand.vmem [shape: f32[32,96], index: 1, kind: input, shape index: {}]   ;;  %s2086_s2 = inlined_call_operand.vmem [shape: f32[32,32], index: 2, kind: input, shape index: {}]   ;;  %s2087_s3 = inlined_call_operand.vmem [shape: f32[32,128], index: 3, kind: input, shape index: {}]   ;;  %s2088_s4 = inlined_call_operand.vmem [shape: f32[1,128], index: 4, kind: input, shape index: {}]   ;;  %s2089_s5 = inlined_call_operand.vmem [shape: f32[128,32], index: 5, kind: input, shape index: {}]   ;;  %s2090_s6 = inlined_call_operand.vmem [shape: f32[1,32], index: 6, kind: input, shape index: {}]   ;;  %s2091_s7 = inlined_call_operand.hbm [shape: f32[2,8,32], index: 7, kind: output, shape index: {}]  }
   0x1   :  { %14 = vsyncpa [#allocation4 + $0x1], 0  ;;  %s1790_s24 = smov 0   ;;  %s1792_s25 = smov 0  }
   0x2   :  { %s1794_s26 = smov 0   ;;  %s1796_s27 = smov 0  }
   0x3 LB: > { %s1811_s28 = sadd.s32 4294967295, %s1731_s27   ;;  %s1407_s29 = sadd.s32 4294967294, %s1731_s27   ;;  %s1731_s27 = sphi %s1796_s27, %s2097_s27   ;;  %s1727_s26 = sphi %s1794_s26, %s2096_s26   ;;  %s1723_s25 = sphi %s1792_s25, %s2095_s25   ;;  %s1719_s24 = sphi %s1790_s24, %s2094_s24  }
   0x4   : > { %s1815_s30 = sadd.s32 1, %s1731_s27   ;;  %s179_s8 = sadd.s32 1, %s1727_s26 }
   0x5   : > { %s176_s9 = ssub.s32 %s1731_s27, %s1815_s30  ;;  %p189_p0 = scmp.ne.s32.totalorder %s1727_s26, %s1723_s25 }
   0x6   : > { %p177_p1 = scmp.eq.s32.totalorder %s176_s9, 0  ;;  %p190_p2 = scmp.eq.s32.totalorder %s1811_s28, 1 }
   0x7   : > { %p195_p3 = scmp.ne.s32.totalorder %s1723_s25, %s1719_s24  ;;  %p196_p4 = scmp.eq.s32.totalorder %s1407_s29, 1 }
   0x8   : > { %s1826_s10 = scalar_select %p177_p1, %s1727_s26, %s179_s8  }
   0x9   : > { %p1828_p5 = por %p190_p2, %p189_p0  ;;  %p1832_p6 = por %p196_p4, %p195_p3 }
   0xa   : > { %p1410_p7 = scmp.ge.s32.totalorder %s1731_s27, 1  ;;  %p239_p8 = scmp.lt.s32.totalorder %s1731_s27, 3 }
   0xc   : > { %p240_p9 = pnand %p1410_p7, %p239_p8 }
   0xd   : > { %p270_p10 = scmp.lt.s32.totalorder (!%p240_p9), %s1811_s28, 1  ;;  %s1735_s9 = smov (!%p240_p9), 88  }
   0xe   : > { %243 = sbr.rel (%p240_p9) target bundleno = 2192 (0x890), region = 48  ;;  %s1738_s15 = smov (!%p240_p9), 80  }
   0xf   : > { %s1739_s16 = smov (!%p240_p9), 112   ;;  %s1741_s18 = smov (!%p240_p9), 104  }
  0x10   : > { %s1742_s19 = smov (!%p240_p9), 56   ;;  %s1743_s20 = smov (!%p240_p9), 64  }
  0x11   : > { %s1744_s21 = smov (!%p240_p9), 48   ;;  %s1745_s22 = smov (!%p240_p9), 40  }
  0x12   : > { %s1746_s23 = smov (!%p240_p9), 8   ;;  %s1431_s29 = sshll.u32 (!%p240_p9), %s1811_s28, 7 }
  0x13   : > { %s271_s13 = scalar_select %p270_p10, %s1811_s28, 1  ;;  %vm276_vm0 = vcmask 261120   ;;  %v294_v3 = vld [vmem:[%s2085_s1 + $0x18] sm:$0xff]  ;;  %v1733_v4 = vmov 0.0   ;;  %v293_v5 = vld [vmem:[%s2085_s1 + $0x10] sm:$0xff]  ;;  %vm1734_vm1 = vmmov 0   ;;  %v368_v27 = vlaneseq }
  0x14   : > { %1482 = vmatprep.subr.mxu1 %v1733_v4  ;;  %1490 = vmatprep.mubr.msk.f32.mxu1 %vm1734_vm1, %v1733_v4  ;;  %v292_v6 = vld [vmem:[%s2085_s1 + $0x8] sm:$0xff]  ;;  %v291_v7 = vld [vmem:[%s2085_s1] sm:$0xff]  ;;  %vm376_vm4 = vcmask 64512   ;;  %vm710_vm6 = vcmask 130112   ;;  %vm882_vm7 = vcmask 195712   ;;  %vm1054_vm8 = vcmask 261312  }
  0x15   : > { %s1412_s14 = sshll.u32 %s271_s13, 3  ;;  %1483 = vmatpush3.msra.mxu1 %v294_v3  ;;  %1503 = vmatprep.subr.mxu0 %v1733_v4  ;;  %s1736_s13 = smov 96   ;;  %v369_v28 = vshrl.u32 %v368_v27, 7  ;;  %v371_v29 = vand.u32 127, %v368_v27  ;;  %v1057_v27 = vld [vmem:[%s2086_s2] sm:$0xff] }
  0x16   : > { %s273_s17 = scalar_lea.vmem %s2084_s0, %s1412_s14  ;;  %1484 = vmatprep.subr.mxu1 %v1733_v4  ;;  %1505 = vmatprep.mubr.msk.f32.mxu0 %vm1734_vm1, %v1733_v4  ;;  %s1737_s14 = smov 120  }
  0x17   : > { %v1843_v0 = vld [vmem:[%s273_s17] sm:$0xff]  ;;  %1485 = vmatpush3.msra.mxu1 %v293_v5  ;;  %s1740_s17 = smov 72   ;;  %vm372_vm5 = vcmp.gt.s32.totalorder %v371_v29, %v369_v28  ;;  %s1749_s28 = smov [#allocation3]  }
  0x18   : > { %v275_v1 = vmul.f32 %v1843_v0, %v1843_v0  ;;  %1486 = vmatprep.subr.mxu1 %v1733_v4 }
  0x19   : > { %1487 = vmatpush3.msra.mxu1 %v292_v6 }
  0x1a   : > { %v277_v2 = vsel %vm276_vm0, %v275_v1, 0.0  ;;  %1488 = vmatprep.subr.mxu1 %v1733_v4 }
  0x1b   : > { %278 = vadd.xlane.f32.xlu0 %v277_v2  ;;  %1489 = vmatpush3.msra.mxu1 %v291_v7 }
  0x1c   : > { %1493 = vmatprep.subr.mxu1 %v1733_v4 }
  0xa4   : > { %v279_v8 = vpop.xlane.xlu0 %278 }
  0xa5   : > { %1645 = vrsqrt.f32 %v279_v8  ;;  %vm282_vm2 = vcmp.eq.f32.partialorder %v279_v8, inf  ;;  %v285_v11 = vand.u32 2147483648, %v279_v8  ;;  %vm284_vm3 = vcmp.eq.f32.partialorder %v279_v8, 0.0 }
  0xb2   : > { %v1646_v9 = vpop.eup %1645 }
  0xb3   : > { %v281_v10 = vmul.f32 %v1646_v9, %v279_v8 }
  0xb5   : > { %v283_v12 = vsel %vm282_vm2, %v279_v8, %v281_v10 }
  0xb6   : > { %v286_v13 = vsel %vm284_vm3, %v285_v11, %v283_v12 }
  0xb7   : > { %v287_v14 = vmul.f32 0.17677669, %v286_v13 }
  0xb9   : > { %v288_v15 = vadd.f32 1e-08, %v287_v14 }
  0xbb   : > { %1647 = vrcp.f32 %v288_v15 }
  0xc8   : > { %v1648_v16 = vpop.eup %1647 }
  0xc9   : > { %v290_v17 = vmul.f32 %v1648_v16, %v1843_v0 }
  0xcb   : > { %1491 = vmatmul.mubr.msk.f32.vlgmr.msra.gmra.mxu1 %vm276_vm0, %v290_v17 }
  0xcc   : > { %1495 = vmatprep.mubr.msk.f32.mxu1 %vm1734_vm1, %v1733_v4 }
 0x18b   : > { %v1874_v18 = vpop.f32.mrf.mxu1 }
 0x18c   : > { %542 = vrot.lane.b32.xlu1 %v1874_v18, %s1735_s9  ;;  %374 = vrot.lane.b32.xlu0 %v1874_v18, %s1736_s13 }
 0x18d   : > { %v1492_v19 = vpop.f32.mrf.mxu1 }
 0x190   : > { %540 = vrot.lane.b32.xlu1 %v1874_v18, %s1737_s14 }
 0x194   : > { %714 = vrot.lane.b32.xlu1 %v1874_v18, %s1738_s15  ;;  %s1346_s15 = scalar_lea.hbm %s2091_s7, %s1431_s29 }
 0x198   : > { %712 = vrot.lane.b32.xlu1 %v1874_v18, %s1739_s16 }
 0x19c   : > { %886 = vrot.lane.b32.xlu1 %v1874_v18, %s1740_s17 }
 0x1a0   : > { %884 = vrot.lane.b32.xlu1 %v1874_v18, %s1741_s18  ;;  %s1747_s18 = smov 16  }
 0x1fe   : > { %v543_v20 = vpop.permute.xlu1 %542  ;;  %v375_v21 = vpop.permute.xlu0 %374 }
 0x1ff   : > { %1494 = vmatpush3.xpose.msk.msra.mxu1 %vm376_vm4, %v375_v21  ;;  %1504 = vmatpush3.xpose.msk.msra.mxu0 %vm376_vm4, %v543_v20 }
 0x200   : > { %1513 = vmatprep.subr.mxu0 %v1733_v4  ;;  %1498 = vmatprep.subr.mxu1 %v1733_v4 }
 0x202   : > { %v541_v22 = vpop.permute.xlu1 %540  ;;  %1496 = vmatmul.mubr.msk.f32.vlgmr.msra.gmra.mxu1 %vm376_vm4, %v1874_v18 }
 0x203   : > { %1506 = vmatmul.mubr.msk.f32.vlgmr.msra.gmra.mxu0 %vm376_vm4, %v541_v22  ;;  %1500 = vmatprep.mubr.msk.f32.mxu1 %vm1734_vm1, %v1733_v4 }
 0x204   : > { %1515 = vmatprep.mubr.msk.f32.mxu0 %vm1734_vm1, %v1733_v4 }
 0x206   : > { %v715_v23 = vpop.permute.xlu1 %714 }
 0x207   : > { %1514 = vmatpush3.xpose.msk.msra.mxu0 %vm376_vm4, %v715_v23 }
 0x208   : > { %1523 = vmatprep.subr.mxu0 %v1733_v4 }
 0x20a   : > { %v713_v24 = vpop.permute.xlu1 %712 }
 0x20b   : > { %1516 = vmatmul.mubr.msk.f32.vlgmr.msra.gmra.mxu0 %vm376_vm4, %v713_v24  ;;  %v1060_v24 = vld [vmem:[%s2086_s2 + $0x18] sm:$0xff] }
 0x20c   : > { %1525 = vmatprep.mubr.msk.f32.mxu0 %vm1734_vm1, %v1733_v4 }
 0x20e   : > { %v887_v25 = vpop.permute.xlu1 %886 }
 0x20f   : > { %1524 = vmatpush3.xpose.msk.msra.mxu0 %vm376_vm4, %v887_v25  ;;  %v1059_v25 = vld [vmem:[%s2086_s2 + $0x10] sm:$0xff] }
 0x210   : > { %1555 = vmatprep.subr.mxu0 %v1733_v4 }
 0x212   : > { %v885_v26 = vpop.permute.xlu1 %884 }
 0x213   : > { %1526 = vmatmul.mubr.msk.f32.vlgmr.msra.gmra.mxu0 %vm376_vm4, %v885_v26  ;;  %v1058_v26 = vld [vmem:[%s2086_s2 + $0x8] sm:$0xff] }
 0x214   : > { %1587 = vmatprep.mubr.msk.f32.mxu0 %vm1734_vm1, %v1733_v4 }
 0x2c2   : > { %v447_v30 = vpop.f32.mrf.mxu1 }
 0x2c3   : > { %v451_v31 = vsel %vm372_vm5, -1e+30, %v447_v30  ;;  %v614_v32 = vpop.f32.mrf.mxu0 }
 0x2c4   : > { %v618_v33 = vsel %vm372_vm5, -1e+30, %v614_v32  ;;  %v1497_v34 = vpop.f32.mrf.mxu1  ;;  %v452_v35 = vsel %vm376_vm4, %v451_v31, -inf }
 0x2c5   : > { %v1507_v36 = vpop.f32.mrf.mxu0  ;;  %453 = vmax.xlane.f32.xlu1 %v452_v35  ;;  %v619_v37 = vsel %vm376_vm4, %v618_v33, -inf }
 0x2c6   : > { %620 = vmax.xlane.f32.xlu0 %v619_v37 }
 0x2cb   : > { %v786_v38 = vpop.f32.mrf.mxu0 }
 0x2cc   : > { %v790_v39 = vsel %vm372_vm5, -1e+30, %v786_v38 }
 0x2cd   : > { %v1517_v40 = vpop.f32.mrf.mxu0  ;;  %v791_v41 = vsel %vm376_vm4, %v790_v39, -inf }
 0x2ce   : > { %792 = vmax.xlane.f32.xlu0 %v791_v41  ;;  %v1153_v41 = vld [vmem:[%s2087_s3 + $0x18] sm:$0xff] }
 0x2d3   : > { %v958_v42 = vpop.f32.mrf.mxu0 }
 0x2d4   : > { %v962_v43 = vsel %vm372_vm5, -1e+30, %v958_v42  ;;  %v1152_v42 = vld [vmem:[%s2087_s3 + $0x10] sm:$0xff] }
 0x2d5   : > { %v1527_v44 = vpop.f32.mrf.mxu0  ;;  %v963_v45 = vsel %vm376_vm4, %v962_v43, -inf }
 0x2d6   : > { %964 = vmax.xlane.f32.xlu1 %v963_v45  ;;  %v1254_v44 = vld [vmem:[%s2089_s5 + $0x78] sm:$0xff]  ;;  %v1253_v45 = vld [vmem:[%s2089_s5 + $0x70] sm:$0xff] }
 0x2d7   : > { %1556 = vmatpush3.msra.mxu0 %v1254_v44 }
 0x2d8   : > { %1557 = vmatprep.subr.mxu0 %v1733_v4 }
 0x2d9   : > { %1558 = vmatpush3.msra.mxu0 %v1253_v45 }
 0x2da   : > { %1559 = vmatprep.subr.mxu0 %v1733_v4 }
 0x2e7   : > { %630 = vrot.lane.b32.xlu1 %v1874_v18, %s1742_s19  ;;  %s1748_s19 = smov 24  }
 0x34e   : > { %v454_v46 = vpop.xlane.xlu1 %453 }
 0x34f   : > { %v455_v47 = vsub.f32 %v451_v31, %v454_v46  ;;  %v621_v48 = vpop.xlane.xlu0 %620  ;;  %v1252_v46 = vld [vmem:[%s2089_s5 + $0x68] sm:$0xff] }
 0x350   : > { %v622_v49 = vsub.f32 %v618_v33, %v621_v48  ;;  %1560 = vmatpush3.msra.mxu0 %v1252_v46 }
 0x351   : > { %v456_v50 = vmul.f32 1.442695, %v455_v47  ;;  %v1251_v47 = vld [vmem:[%s2089_s5 + $0x60] sm:$0xff]  ;;  %1561 = vmatprep.subr.mxu0 %v1733_v4 }
 0x352   : > { %v623_v51 = vmul.f32 1.442695, %v622_v49  ;;  %1562 = vmatpush3.msra.mxu0 %v1251_v47 }
 0x353   : > { %1649 = vpow2.f32 %v456_v50  ;;  %1563 = vmatprep.subr.mxu0 %v1733_v4 }
 0x354   : > { %1651 = vpow2.f32 %v623_v51 }
 0x357   : > { %v793_v61 = vpop.xlane.xlu0 %792 }
 0x358   : > { %v794_v62 = vsub.f32 %v790_v39, %v793_v61  ;;  %v1247_v61 = vld [vmem:[%s2089_s5 + $0x40] sm:$0xff] }
 0x35a   : > { %v795_v63 = vmul.f32 1.442695, %v794_v62  ;;  %v1246_v62 = vld [vmem:[%s2089_s5 + $0x38] sm:$0xff] }
 0x35f   : > { %v965_v52 = vpop.xlane.xlu1 %964 }
 0x360   : > { %v1650_v53 = vpop.eup %1649  ;;  %v966_v54 = vsub.f32 %v962_v43, %v965_v52  ;;  %v1150_v43 = vld [vmem:[%s2087_s3] sm:$0xff] }
 0x361   : > { %v1652_v55 = vpop.eup %1651  ;;  %v458_v56 = vsel %vm376_vm4, %v1650_v53, 0.0 }
 0x362   : > { %v967_v57 = vmul.f32 1.442695, %v966_v54  ;;  %459 = vadd.xlane.f32.xlu0 %v458_v56  ;;  %v625_v58 = vsel %vm376_vm4, %v1652_v55, 0.0 }
 0x363   : > { %626 = vadd.xlane.f32.xlu1 %v625_v58  ;;  %v631_v3 = vpop.permute.xlu1 %630  ;;  %v1250_v58 = vld [vmem:[%s2089_s5 + $0x58] sm:$0xff] }
 0x364   : > { %1653 = vpow2.f32 %v967_v57  ;;  %1564 = vmatpush3.msra.mxu0 %v1250_v58 }
 0x365   : > { %1655 = vpow2.f32 %v795_v63  ;;  %1565 = vmatprep.subr.mxu0 %v1733_v4  ;;  %v1245_v63 = vld [vmem:[%s2089_s5 + $0x30] sm:$0xff] }
 0x371   : > { %v1654_v59 = vpop.eup %1653 }
 0x372   : > { %v969_v60 = vsel %vm376_vm4, %v1654_v59, 0.0  ;;  %v1656_v1 = vpop.eup %1655 }
 0x373   : > { %970 = vadd.xlane.f32.xlu1 %v969_v60  ;;  %v797_v2 = vsel %vm376_vm4, %v1656_v1, 0.0  ;;  %v1248_v60 = vld [vmem:[%s2089_s5 + $0x48] sm:$0xff] }
 0x378   : > { %463 = vrot.lane.b32.xlu0 %v1874_v18, %s1743_s20  ;;  %s267_s20 = sand.u32 1, %s1723_s25  }
 0x379   : > { %s1335_s16 = scalar_lea.sflag [#allocation4], %s267_s20 }
 0x384   : > { %802 = vrot.lane.b32.xlu1 %v1874_v18, %s1744_s21  ;;  %s1411_s21 = sshll.u32 %s267_s20, 3 }
 0x385   : > { %s269_s8 = scalar_lea.vmem [#allocation3], %s1411_s21 }
 0x386   : > { %s1348_s9 = sshll.u32 %s269_s8, 4  ;;  %s1349_s9 = int_to_ptr.vmem [resolvable:$true] %s1348_s9 }
 0x387   : > { %s1671_s17 = scalar_lea.vmem %s1349_s9, 128 }
 0x388   : > { %p1672_p11 = scmp.ne.s32.totalorder %s1349_s9, %s1671_s17 }
 0x38a   : > { %p1673_p12 = pnand %p1672_p11, %p1828_p5 }
 0x38c   : > { %p1674_p13 = pneg %p1673_p12 }
 0x397   : > { %798 = vadd.xlane.f32.xlu0 %v797_v2  ;;  %v1243_v2 = vld [vmem:[%s2089_s5 + $0x20] sm:$0xff] }
 0x3ad   : > { %974 = vrot.lane.b32.xlu0 %v1874_v18, %s1745_s22 }
 0x3eb   : > { %v460_v5 = vpop.xlane.xlu0 %459 }
 0x3ec   : > { %1657 = vrcp.f32 %v460_v5  ;;  %v627_v6 = vpop.xlane.xlu1 %626  ;;  %v1241_v5 = vld [vmem:[%s2089_s5 + $0x10] sm:$0xff] }
 0x3ed   : > { %1659 = vrcp.f32 %v627_v6  ;;  %v1240_v6 = vld [vmem:[%s2089_s5 + $0x8] sm:$0xff] }
 0x3ef   : > { %v464_v7 = vpop.permute.xlu0 %463 }
 0x3f0   : > { %1499 = vmatpush3.msra.mxu1 %v464_v7  ;;  %v1239_v7 = vld [vmem:[%s2089_s5] sm:$0xff] }
 0x3f1   : > { %1508 = vmatprep.subr.mxu1 %v1733_v4 }
 0x3f9   : > { %v1658_v8 = vpop.eup %1657 }
 0x3fa   : > { %v462_v9 = vmul.f32 %v1658_v8, %v1650_v53  ;;  %v1660_v10 = vpop.eup %1659  ;;  %v1427_v8 = vld [vmem:[%s2088_s4] ss:$0 sm:$0xff] }
 0x3fb   : > { %v629_v12 = vmul.f32 %v1660_v10, %v1652_v55 }
 0x3fc   : > { %1501 = vmatmul.mubr.msk.f32.vlgmr.msra.gmra.mxu1 %vm376_vm4, %v462_v9  ;;  %v971_v11 = vpop.xlane.xlu1 %970 }
 0x3fd   : > { %1509 = vmatpush3.msra.mxu1 %v631_v3  ;;  %1510 = vmatprep.mubr.msk.f32.mxu1 %vm1734_vm1, %v1733_v4  ;;  %v1242_v3 = vld [vmem:[%s2089_s5 + $0x18] sm:$0xff] }
 0x3fe   : > { %1518 = vmatprep.subr.mxu1 %v1733_v4 }
 0x400   : > { %1511 = vmatmul.mubr.msk.f32.vlgmr.msra.gmra.mxu1 %vm376_vm4, %v629_v12  ;;  %v803_v13 = vpop.permute.xlu1 %802 }
 0x401   : > { %1519 = vmatpush3.msra.mxu1 %v803_v13  ;;  %1520 = vmatprep.mubr.msk.f32.mxu1 %vm1734_vm1, %v1733_v4 }
 0x402   : > { %1528 = vmatprep.subr.mxu1 %v1733_v4 }
 0x420   : > { %v799_v14 = vpop.xlane.xlu0 %798 }
 0x421   : > { %1661 = vrcp.f32 %v799_v14 }
 0x422   : > { %1663 = vrcp.f32 %v971_v11 }
 0x424   : > { %v975_v18 = vpop.permute.xlu0 %974 }
 0x42e   : > { %v1662_v15 = vpop.eup %1661 }
 0x42f   : > { %v801_v16 = vmul.f32 %v1662_v15, %v1656_v1  ;;  %v1664_v17 = vpop.eup %1663  ;;  %v1244_v1 = vld [vmem:[%s2089_s5 + $0x28] sm:$0xff] }
 0x430   : > { %v973_v19 = vmul.f32 %v1664_v17, %v1654_v59  ;;  %v1249_v59 = vld [vmem:[%s2089_s5 + $0x50] sm:$0xff] }
 0x431   : > { %1521 = vmatmul.mubr.msk.f32.vlgmr.msra.gmra.mxu1 %vm376_vm4, %v801_v16  ;;  %1566 = vmatpush3.msra.mxu0 %v1249_v59 }
 0x432   : > { %1529 = vmatpush3.msra.mxu1 %v975_v18  ;;  %1530 = vmatprep.mubr.msk.f32.mxu1 %vm1734_vm1, %v1733_v4 }
 0x433   : > { %1533 = vmatprep.subr.mxu1 %v1733_v4  ;;  %1567 = vmatprep.subr.mxu0 %v1733_v4 }
 0x434   : > { %1568 = vmatpush3.msra.mxu0 %v1248_v60 }
 0x435   : > { %1531 = vmatmul.mubr.msk.f32.vlgmr.msra.gmra.mxu1 %vm376_vm4, %v973_v19  ;;  %1569 = vmatprep.subr.mxu0 %v1733_v4 }
 0x436   : > { %1541 = vmatprep.mubr.msk.f32.mxu1 %vm1734_vm1, %v1733_v4  ;;  %1534 = vmatpush3.msra.mxu1 %v1060_v24 }
 0x437   : > { %1535 = vmatprep.subr.mxu1 %v1733_v4  ;;  %1570 = vmatpush3.msra.mxu0 %v1247_v61 }
 0x438   : > { %1536 = vmatpush3.msra.mxu1 %v1059_v25  ;;  %1571 = vmatprep.subr.mxu0 %v1733_v4 }
 0x439   : > { %1537 = vmatprep.subr.mxu1 %v1733_v4  ;;  %1572 = vmatpush3.msra.mxu0 %v1246_v62 }
 0x43a   : > { %1538 = vmatpush3.msra.mxu1 %v1058_v26  ;;  %1573 = vmatprep.subr.mxu0 %v1733_v4 }
 0x43b   : > { %1539 = vmatprep.subr.mxu1 %v1733_v4  ;;  %1574 = vmatpush3.msra.mxu0 %v1245_v63 }
 0x43c   : > { %1540 = vmatpush3.msra.mxu1 %v1057_v27  ;;  %1575 = vmatprep.subr.mxu0 %v1733_v4 }
 0x43d   : > { %1544 = vmatprep.subr.mxu1 %v1733_v4  ;;  %1576 = vmatpush3.msra.mxu0 %v1244_v1 }
 0x43e   : > { %1577 = vmatprep.subr.mxu0 %v1733_v4 }
 0x43f   : > { %1578 = vmatpush3.msra.mxu0 %v1243_v2 }
 0x440   : > { %1579 = vmatprep.subr.mxu0 %v1733_v4 }
 0x441   : > { %1580 = vmatpush3.msra.mxu0 %v1242_v3 }
 0x442   : > { %1581 = vmatprep.subr.mxu0 %v1733_v4 }
 0x443   : > { %1582 = vmatpush3.msra.mxu0 %v1241_v5 }
 0x444   : > { %1583 = vmatprep.subr.mxu0 %v1733_v4 }
 0x445   : > { %1584 = vmatpush3.msra.mxu0 %v1240_v6 }
 0x446   : > { %1585 = vmatprep.subr.mxu0 %v1733_v4 }
 0x447   : > { %1586 = vmatpush3.msra.mxu0 %v1239_v7 }
 0x4bc   : > { %v535_v20 = vpop.f32.mrf.mxu1 }
 0x4bd   : > { %539 = vst.msk [vmem:[#allocation2] sm:$0xff] %vm376_vm4, %v535_v20 }
 0x4be   : > { %v1502_v21 = vpop.f32.mrf.mxu1 }
 0x4c0   : > { %v702_v22 = vpop.f32.mrf.mxu1 }
 0x4c1   : > { %707 = vrot.lane.b32.xlu1 %v702_v22, %s1746_s23 }
 0x4c2   : > { %v1512_v23 = vpop.f32.mrf.mxu1 }
 0x4f1   : > { %v874_v28 = vpop.f32.mrf.mxu1 }
 0x4f2   : > { %879 = vrot.lane.b32.xlu0 %v874_v28, %s1747_s18  ;;  %s1675_s18 = sshll.u32 %s1749_s28, 4  ;;  %s1676_s18 = int_to_ptr.vmem [resolvable:$false] %s1675_s18 }
 0x4f3   : > { %v1522_v29 = vpop.f32.mrf.mxu1  ;;  %p1678_p0 = scmp.lt.s32.totalorder %s1349_s9, %s1676_s18 }
 0x4f5   : > { %v1046_v30 = vpop.f32.mrf.mxu1 }
 0x4f6   : > { %1051 = vrot.lane.b32.xlu1 %v1046_v30, %s1748_s19  ;;  %s1677_s19 = scalar_lea.vmem %s1676_s18, 256 }
 0x4f7   : > { %v1532_v31 = vpop.f32.mrf.mxu1  ;;  %p1679_p1 = scmp.lt.s32.totalorder %s1677_s19, %s1671_s17 }
 0x4f9   : > { %p1680_p2 = por %p1679_p1, %p1678_p0 }
 0x4fb   : > { %p1681_p3 = pnand %p1680_p2, %p1674_p13 }
 0x533   : > { %v708_v32 = vpop.permute.xlu1 %707 }
 0x534   : > { %711 = vst.msk [vmem:[#allocation2] sm:$0xff] %vm710_vm6, %v708_v32 }
 0x564   : > { %v880_v33 = vpop.permute.xlu0 %879 }
 0x565   : > { %883 = vst.msk [vmem:[#allocation2] sm:$0xff] %vm882_vm7, %v880_v33 }
 0x568   : > { %v1052_v34 = vpop.permute.xlu1 %1051 }
 0x569   : > { %1055 = vst.msk [vmem:[#allocation2] sm:$0xff] %vm1054_vm8, %v1052_v34 }
 0x570   : > { %v1056_v35 = vld [vmem:[#allocation2] sm:$0xff] }
 0x571   : > { %1542 = vmatmul.mubr.msk.f32.vlgmr.msra.gmra.mxu1 %vm276_vm0, %v1056_v35 }
 0x572   : > { %1552 = vmatprep.mubr.msk.f32.mxu1 %vm1734_vm1, %v1733_v4  ;;  %1545 = vmatpush3.msra.mxu1 %v1153_v41 }
 0x573   : > { %1546 = vmatprep.subr.mxu1 %v1733_v4 }
 0x574   : > { %1547 = vmatpush3.msra.mxu1 %v1152_v42 }
 0x575   : > { %1548 = vmatprep.subr.mxu1 %v1733_v4 }
 0x631   : > { %v1130_v36 = vpop.f32.mrf.mxu1 }
 0x632   : > { %v1957_v37 = vadd.f32 %v1130_v36, %v1843_v0  ;;  %v1151_v0 = vld [vmem:[%s2087_s3 + $0x8] sm:$0xff] }
 0x633   : > { %v1543_v38 = vpop.f32.mrf.mxu1  ;;  %1549 = vmatpush3.msra.mxu1 %v1151_v0 }
 0x634   : > { %v1135_v39 = vmul.f32 %v1957_v37, %v1957_v37  ;;  %1550 = vmatprep.subr.mxu1 %v1733_v4  ;;  %v1429_v4 = vld [vmem:[%s2090_s6] ss:$0 sm:$0xff] }
 0x635   : > { %1551 = vmatpush3.msra.mxu1 %v1150_v43 }
 0x636   : > { %v1136_v40 = vsel %vm276_vm0, %v1135_v39, 0.0 }
 0x637   : > { %1137 = vadd.xlane.f32.xlu0 %v1136_v40 }
 0x6c0   : > { %v1138_v48 = vpop.xlane.xlu0 %1137 }
 0x6c1   : > { %1665 = vrsqrt.f32 %v1138_v48  ;;  %vm1141_vm9 = vcmp.eq.f32.partialorder %v1138_v48, inf  ;;  %v1144_v51 = vand.u32 2147483648, %v1138_v48  ;;  %vm1143_vm10 = vcmp.eq.f32.partialorder %v1138_v48, 0.0 }
 0x6ce   : > { %v1666_v49 = vpop.eup %1665 }
 0x6cf   : > { %v1140_v50 = vmul.f32 %v1666_v49, %v1138_v48 }
 0x6d1   : > { %v1142_v52 = vsel %vm1141_vm9, %v1138_v48, %v1140_v50 }
 0x6d2   : > { %v1145_v53 = vsel %vm1143_vm10, %v1144_v51, %v1142_v52 }
 0x6d3   : > { %v1146_v54 = vmul.f32 0.17677669, %v1145_v53 }
 0x6d5   : > { %v1147_v55 = vadd.f32 1e-08, %v1146_v54 }
 0x6d7   : > { %1667 = vrcp.f32 %v1147_v55 }
 0x6e4   : > { %v1668_v56 = vpop.eup %1667 }
 0x6e5   : > { %v1149_v57 = vmul.f32 %v1668_v56, %v1957_v37 }
 0x6e7   : > { %1553 = vmatmul.mubr.msk.f32.vlgmr.msra.gmra.mxu1 %vm276_vm0, %v1149_v57 }
 0x7a7   : > { %v1230_v9 = vpop.f32.mrf.mxu1 }
 0x7a8   : > { %v1231_v10 = vadd.f32 %v1427_v8, %v1230_v9 }
 0x7a9   : > { %v1554_v11 = vpop.f32.mrf.mxu1 }
 0x7aa   : > { %v1235_v12 = vmul.f32 0.70710677, %v1231_v10  ;;  %v1234_v14 = vmul.f32 0.5, %v1231_v10 }
 0x7ac   : > { %1669 = verf.f32 %v1235_v12 }
 0x7b9   : > { %v1670_v13 = vpop.eup %1669 }
 0x7ba   : > { %v1237_v15 = vadd.f32 1.0, %v1670_v13 }
 0x7bc   : > { %v1238_v16 = vmul.f32 %v1237_v15, %v1234_v14 }
 0x7be   : > { %1588 = vmatmul.mubr.f32.vlgmr.msra.gmra.mxu0 %v1238_v16 }
 0x87e   : > { %v1328_v17 = vpop.f32.mrf.mxu0 }
 0x87f   : > { %v1329_v18 = vadd.f32 %v1429_v4, %v1328_v17 }
 0x880   : > { %v1589_v19 = vpop.f32.mrf.mxu0 }
 0x881   : > { %v1332_v20 = vadd.f32 %v1329_v18, %v1957_v37 }
 0x883   : > { %1333 = vst.msk [vmem:[%s269_s8] sm:$0xff] %vm276_vm0, %v1332_v20 }
 0x884   : > { %1684 = shalt.err (!%p1681_p3)
}
 0x885   : > { %s1685_s21 = scalar_lea.hbm %s1346_s15, 128  ;;  %s1689_s23 = scalar_lea.hbm %s2091_s7, 256 }
 0x886   : > { %p1686_p4 = scmp.ne.s32.totalorder %s1346_s15, %s1685_s21  ;;  %p1690_p9 = scmp.lt.s32.totalorder %s1346_s15, %s2091_s7 }
 0x887   : > { %p1691_p10 = scmp.lt.s32.totalorder %s1689_s23, %s1685_s21 }
 0x888   : > { %p1687_p7 = pnand %p1686_p4, %p1828_p5 }
 0x889   : > { %p1692_p11 = por %p1691_p10, %p1690_p9 }
 0x88a   : > { %p1688_p8 = pneg %p1687_p7 }
 0x88c   : > { %p1693_p12 = pnand %p1692_p11, %p1688_p8 }
 0x88e   : > { %1696 = shalt.err (!%p1693_p12)
}
 0x88f   : > { %1590 = dma.vmem_to_hbm [thread:$0]  (%p1828_p5), %s1349_s9, 128, %s1346_s15, %s1335_s16  }
 0x890 PF: > { %p1596_p13 = scmp.ge.s32.totalorder %s1731_s27, 2  ;;  %s1360_s13 = sand.u32 1, %s1719_s24  }
 0x891   : > { %s1361_s14 = scalar_lea.sflag [#allocation4], %s1360_s13 }
 0x892   : > { %p1593_p0 = pnand %p1596_p13, %p1832_p6 }
 0x894   : > { %p1594_p1 = pneg %p1593_p0 }
 0x896   : > { %1714 = dma.done.wait (%p1594_p1), %s1361_s14, 128  }
 0x897   : > { %1716 = vsyncadd (%p1594_p1), %s1361_s14, 4294967168  ;;  %p17_p2 = scmp.ge.s32.totalorder %s1815_s30, 4   ;;  %s2094_s24 = smov %s1723_s25 }
 0x898   : > { %s2095_s25 = smov %s1727_s26  ;;  %s2096_s26 = smov %s1826_s10 }
 0x899   : > { %s2097_s27 = smov %s1815_s30  ;;  %19 = sbr.rel (!%p17_p2) target bundleno = 3 (0x3), region = 83 }
 0x89e   :  { %1366 = vsyncpa [#allocation4], 1 }
 0x89f   :  { %1368 = vsyncpa [#allocation4 + $0x1], 1 }

// kernel: tpu_custom_call.1
= control target key start
LH: loop header
LB: loop body
LE: loop exit
PB: predicated region body
PF: predicated region fallthrough
CT: control target
= control target key end

     0   :  { %12 = vsyncpa [#allocation4], 0  ;;  %s2084_s0 = inlined_call_operand.vmem [shape: f32[2,8,32], index: 0, kind: input, shape index: {}]   ;;  %s2085_s1 = inlined_call_operand.vmem [shape: f32[32,96], index: 1, kind: input, shape index: {}]   ;;  %s2086_s2 = inlined_call_operand.vmem [shape: f32[32,32], index: 2, kind: input, shape index: {}]   ;;  %s2087_s3 = inlined_call_operand.vmem [shape: f32[32,128], index: 3, kind: input, shape index: {}]   ;;  %s2088_s4 = inlined_call_operand.vmem [shape: f32[1,128], index: 4, kind: input, shape index: {}]   ;;  %s2089_s5 = inlined_call_operand.vmem [shape: f32[128,32], index: 5, kind: input, shape index: {}]   ;;  %s2090_s6 = inlined_call_operand.vmem [shape: f32[1,32], index: 6, kind: input, shape index: {}]   ;;  %s2091_s7 = inlined_call_operand.hbm [shape: f32[2,8,32], index: 7, kind: output, shape index: {}]  }
   0x1   :  { %14 = vsyncpa [#allocation4 + $0x1], 0  ;;  %s1790_s24 = smov 0   ;;  %s1792_s25 = smov 0  }
   0x2   :  { %s1794_s26 = smov 0   ;;  %s1796_s27 = smov 0  }
   0x3 LB: > { %s1811_s28 = sadd.s32 4294967295, %s1731_s27   ;;  %s1407_s29 = sadd.s32 4294967294, %s1731_s27   ;;  %s1731_s27 = sphi %s1796_s27, %s2097_s27   ;;  %s1727_s26 = sphi %s1794_s26, %s2096_s26   ;;  %s1723_s25 = sphi %s1792_s25, %s2095_s25   ;;  %s1719_s24 = sphi %s1790_s24, %s2094_s24  }
   0x4   : > { %s1815_s30 = sadd.s32 1, %s1731_s27   ;;  %s179_s8 = sadd.s32 1, %s1727_s26 }
   0x5   : > { %s176_s9 = ssub.s32 %s1731_s27, %s1815_s30  ;;  %p189_p0 = scmp.ne.s32.totalorder %s1727_s26, %s1723_s25 }
   0x6   : > { %p177_p1 = scmp.eq.s32.totalorder %s176_s9, 0  ;;  %p190_p2 = scmp.eq.s32.totalorder %s1811_s28, 1 }
   0x7   : > { %p195_p3 = scmp.ne.s32.totalorder %s1723_s25, %s1719_s24  ;;  %p196_p4 = scmp.eq.s32.totalorder %s1407_s29, 1 }
   0x8   : > { %s1826_s10 = scalar_select %p177_p1, %s1727_s26, %s179_s8  }
   0x9   : > { %p1828_p5 = por %p190_p2, %p189_p0  ;;  %p1832_p6 = por %p196_p4, %p195_p3 }
   0xa   : > { %p1410_p7 = scmp.ge.s32.totalorder %s1731_s27, 1  ;;  %p239_p8 = scmp.lt.s32.totalorder %s1731_s27, 3 }
   0xc   : > { %p240_p9 = pnand %p1410_p7, %p239_p8 }
   0xd   : > { %p270_p10 = scmp.lt.s32.totalorder (!%p240_p9), %s1811_s28, 1  ;;  %s1735_s9 = smov (!%p240_p9), 88  }
   0xe   : > { %243 = sbr.rel (%p240_p9) target bundleno = 2192 (0x890), region = 48  ;;  %s1738_s15 = smov (!%p240_p9), 80  }
   0xf   : > { %s1739_s16 = smov (!%p240_p9), 112   ;;  %s1741_s18 = smov (!%p240_p9), 104  }
  0x10   : > { %s1742_s19 = smov (!%p240_p9), 56   ;;  %s1743_s20 = smov (!%p240_p9), 64  }
  0x11   : > { %s1744_s21 = smov (!%p240_p9), 48   ;;  %s1745_s22 = smov (!%p240_p9), 40  }
  0x12   : > { %s1746_s23 = smov (!%p240_p9), 8   ;;  %s1431_s29 = sshll.u32 (!%p240_p9), %s1811_s28, 7 }
  0x13   : > { %s271_s13 = scalar_select %p270_p10, %s1811_s28, 1  ;;  %vm276_vm0 = vcmask 261120   ;;  %v294_v3 = vld [vmem:[%s2085_s1 + $0x18] sm:$0xff]  ;;  %v1733_v4 = vmov 0.0   ;;  %v293_v5 = vld [vmem:[%s2085_s1 + $0x10] sm:$0xff]  ;;  %vm1734_vm1 = vmmov 0   ;;  %v368_v27 = vlaneseq }
  0x14   : > { %1482 = vmatprep.subr.mxu1 %v1733_v4  ;;  %1490 = vmatprep.mubr.msk.f32.mxu1 %vm1734_vm1, %v1733_v4  ;;  %v292_v6 = vld [vmem:[%s2085_s1 + $0x8] sm:$0xff]  ;;  %v291_v7 = vld [vmem:[%s2085_s1] sm:$0xff]  ;;  %vm376_vm4 = vcmask 64512   ;;  %vm710_vm6 = vcmask 130112   ;;  %vm882_vm7 = vcmask 195712   ;;  %vm1054_vm8 = vcmask 261312  }
  0x15   : > { %s1412_s14 = sshll.u32 %s271_s13, 3  ;;  %1483 = vmatpush3.msra.mxu1 %v294_v3  ;;  %1503 = vmatprep.subr.mxu0 %v1733_v4  ;;  %s1736_s13 = smov 96   ;;  %v369_v28 = vshrl.u32 %v368_v27, 7  ;;  %v371_v29 = vand.u32 127, %v368_v27  ;;  %v1057_v27 = vld [vmem:[%s2086_s2] sm:$0xff] }
  0x16   : > { %s273_s17 = scalar_lea.vmem %s2084_s0, %s1412_s14  ;;  %1484 = vmatprep.subr.mxu1 %v1733_v4  ;;  %1505 = vmatprep.mubr.msk.f32.mxu0 %vm1734_vm1, %v1733_v4  ;;  %s1737_s14 = smov 120  }
  0x17   : > { %v1843_v0 = vld [vmem:[%s273_s17] sm:$0xff]  ;;  %1485 = vmatpush3.msra.mxu1 %v293_v5  ;;  %s1740_s17 = smov 72   ;;  %vm372_vm5 = vcmp.gt.s32.totalorder %v371_v29, %v369_v28  ;;  %s1749_s28 = smov [#allocation3]  }
  0x18   : > { %v275_v1 = vmul.f32 %v1843_v0, %v1843_v0  ;;  %1486 = vmatprep.subr.mxu1 %v1733_v4 }
  0x19   : > { %1487 = vmatpush3.msra.mxu1 %v292_v6 }
  0x1a   : > { %v277_v2 = vsel %vm276_vm0, %v275_v1, 0.0  ;;  %1488 = vmatprep.subr.mxu1 %v1733_v4 }
  0x1b   : > { %278 = vadd.xlane.f32.xlu0 %v277_v2  ;;  %1489 = vmatpush3.msra.mxu1 %v291_v7 }
  0x1c   : > { %1493 = vmatprep.subr.mxu1 %v1733_v4 }
  0xa4   : > { %v279_v8 = vpop.xlane.xlu0 %278 }
  0xa5   : > { %1645 = vrsqrt.f32 %v279_v8  ;;  %vm282_vm2 = vcmp.eq.f32.partialorder %v279_v8, inf  ;;  %v285_v11 = vand.u32 2147483648, %v279_v8  ;;  %vm284_vm3 = vcmp.eq.f32.partialorder %v279_v8, 0.0 }
  0xb2   : > { %v1646_v9 = vpop.eup %1645 }
  0xb3   : > { %v281_v10 = vmul.f32 %v1646_v9, %v279_v8 }
  0xb5   : > { %v283_v12 = vsel %vm282_vm2, %v279_v8, %v281_v10 }
  0xb6   : > { %v286_v13 = vsel %vm284_vm3, %v285_v11, %v283_v12 }
  0xb7   : > { %v287_v14 = vmul.f32 0.17677669, %v286_v13 }
  0xb9   : > { %v288_v15 = vadd.f32 1e-08, %v287_v14 }
  0xbb   : > { %1647 = vrcp.f32 %v288_v15 }
  0xc8   : > { %v1648_v16 = vpop.eup %1647 }
  0xc9   : > { %v290_v17 = vmul.f32 %v1648_v16, %v1843_v0 }
  0xcb   : > { %1491 = vmatmul.mubr.msk.f32.vlgmr.msra.gmra.mxu1 %vm276_vm0, %v290_v17 }
  0xcc   : > { %1495 = vmatprep.mubr.msk.f32.mxu1 %vm1734_vm1, %v1733_v4 }
 0x18b   : > { %v1874_v18 = vpop.f32.mrf.mxu1 }
 0x18c   : > { %542 = vrot.lane.b32.xlu1 %v1874_v18, %s1735_s9  ;;  %374 = vrot.lane.b32.xlu0 %v1874_v18, %s1736_s13 }
 0x18d   : > { %v1492_v19 = vpop.f32.mrf.mxu1 }
 0x190   : > { %540 = vrot.lane.b32.xlu1 %v1874_v18, %s1737_s14 }
 0x194   : > { %714 = vrot.lane.b32.xlu1 %v1874_v18, %s1738_s15  ;;  %s1346_s15 = scalar_lea.hbm %s2091_s7, %s1431_s29 }
 0x198   : > { %712 = vrot.lane.b32.xlu1 %v1874_v18, %s1739_s16 }
 0x19c   : > { %886 = vrot.lane.b32.xlu1 %v1874_v18, %s1740_s17 }
 0x1a0   : > { %884 = vrot.lane.b32.xlu1 %v1874_v18, %s1741_s18  ;;  %s1747_s18 = smov 16  }
 0x1fe   : > { %v543_v20 = vpop.permute.xlu1 %542  ;;  %v375_v21 = vpop.permute.xlu0 %374 }
 0x1ff   : > { %1494 = vmatpush3.xpose.msk.msra.mxu1 %vm376_vm4, %v375_v21  ;;  %1504 = vmatpush3.xpose.msk.msra.mxu0 %vm376_vm4, %v543_v20 }
 0x200   : > { %1513 = vmatprep.subr.mxu0 %v1733_v4  ;;  %1498 = vmatprep.subr.mxu1 %v1733_v4 }
 0x202   : > { %v541_v22 = vpop.permute.xlu1 %540  ;;  %1496 = vmatmul.mubr.msk.f32.vlgmr.msra.gmra.mxu1 %vm376_vm4, %v1874_v18 }
 0x203   : > { %1506 = vmatmul.mubr.msk.f32.vlgmr.msra.gmra.mxu0 %vm376_vm4, %v541_v22  ;;  %1500 = vmatprep.mubr.msk.f32.mxu1 %vm1734_vm1, %v1733_v4 }
 0x204   : > { %1515 = vmatprep.mubr.msk.f32.mxu0 %vm1734_vm1, %v1733_v4 }
 0x206   : > { %v715_v23 = vpop.permute.xlu1 %714 }
 0x207   : > { %1514 = vmatpush3.xpose.msk.msra.mxu0 %vm376_vm4, %v715_v23 }
 0x208   : > { %1523 = vmatprep.subr.mxu0 %v1733_v4 }
 0x20a   : > { %v713_v24 = vpop.permute.xlu1 %712 }
 0x20b   : > { %1516 = vmatmul.mubr.msk.f32.vlgmr.msra.gmra.mxu0 %vm376_vm4, %v713_v24  ;;  %v1060_v24 = vld [vmem:[%s2086_s2 + $0x18] sm:$0xff] }
 0x20c   : > { %1525 = vmatprep.mubr.msk.f32.mxu0 %vm1734_vm1, %v1733_v4 }
 0x20e   : > { %v887_v25 = vpop.permute.xlu1 %886 }
 0x20f   : > { %1524 = vmatpush3.xpose.msk.msra.mxu0 %vm376_vm4, %v887_v25  ;;  %v1059_v25 = vld [vmem:[%s2086_s2 + $0x10] sm:$0xff] }
 0x210   : > { %1555 = vmatprep.subr.mxu0 %v1733_v4 }
 0x212   : > { %v885_v26 = vpop.permute.xlu1 %884 }
 0x213   : > { %1526 = vmatmul.mubr.msk.f32.vlgmr.msra.gmra.mxu0 %vm376_vm4, %v885_v26  ;;  %v1058_v26 = vld [vmem:[%s2086_s2 + $0x8] sm:$0xff] }
 0x214   : > { %1587 = vmatprep.mubr.msk.f32.mxu0 %vm1734_vm1, %v1733_v4 }
 0x2c2   : > { %v447_v30 = vpop.f32.mrf.mxu1 }
 0x2c3   : > { %v451_v31 = vsel %vm372_vm5, -1e+30, %v447_v30  ;;  %v614_v32 = vpop.f32.mrf.mxu0 }
 0x2c4   : > { %v618_v33 = vsel %vm372_vm5, -1e+30, %v614_v32  ;;  %v1497_v34 = vpop.f32.mrf.mxu1  ;;  %v452_v35 = vsel %vm376_vm4, %v451_v31, -inf }
 0x2c5   : > { %v1507_v36 = vpop.f32.mrf.mxu0  ;;  %453 = vmax.xlane.f32.xlu1 %v452_v35  ;;  %v619_v37 = vsel %vm376_vm4, %v618_v33, -inf }
 0x2c6   : > { %620 = vmax.xlane.f32.xlu0 %v619_v37 }
 0x2cb   : > { %v786_v38 = vpop.f32.mrf.mxu0 }
 0x2cc   : > { %v790_v39 = vsel %vm372_vm5, -1e+30, %v786_v38 }
 0x2cd   : > { %v1517_v40 = vpop.f32.mrf.mxu0  ;;  %v791_v41 = vsel %vm376_vm4, %v790_v39, -inf }
 0x2ce   : > { %792 = vmax.xlane.f32.xlu0 %v791_v41  ;;  %v1153_v41 = vld [vmem:[%s2087_s3 + $0x18] sm:$0xff] }
 0x2d3   : > { %v958_v42 = vpop.f32.mrf.mxu0 }
 0x2d4   : > { %v962_v43 = vsel %vm372_vm5, -1e+30, %v958_v42  ;;  %v1152_v42 = vld [vmem:[%s2087_s3 + $0x10] sm:$0xff] }
 0x2d5   : > { %v1527_v44 = vpop.f32.mrf.mxu0  ;;  %v963_v45 = vsel %vm376_vm4, %v962_v43, -inf }
 0x2d6   : > { %964 = vmax.xlane.f32.xlu1 %v963_v45  ;;  %v1254_v44 = vld [vmem:[%s2089_s5 + $0x78] sm:$0xff]  ;;  %v1253_v45 = vld [vmem:[%s2089_s5 + $0x70] sm:$0xff] }
 0x2d7   : > { %1556 = vmatpush3.msra.mxu0 %v1254_v44 }
 0x2d8   : > { %1557 = vmatprep.subr.mxu0 %v1733_v4 }
 0x2d9   : > { %1558 = vmatpush3.msra.mxu0 %v1253_v45 }
 0x2da   : > { %1559 = vmatprep.subr.mxu0 %v1733_v4 }
 0x2e7   : > { %630 = vrot.lane.b32.xlu1 %v1874_v18, %s1742_s19  ;;  %s1748_s19 = smov 24  }
 0x34e   : > { %v454_v46 = vpop.xlane.xlu1 %453 }
 0x34f   : > { %v455_v47 = vsub.f32 %v451_v31, %v454_v46  ;;  %v621_v48 = vpop.xlane.xlu0 %620  ;;  %v1252_v46 = vld [vmem:[%s2089_s5 + $0x68] sm:$0xff] }
 0x350   : > { %v622_v49 = vsub.f32 %v618_v33, %v621_v48  ;;  %1560 = vmatpush3.msra.mxu0 %v1252_v46 }
 0x351   : > { %v456_v50 = vmul.f32 1.442695, %v455_v47  ;;  %v1251_v47 = vld [vmem:[%s2089_s5 + $0x60] sm:$0xff]  ;;  %1561 = vmatprep.subr.mxu0 %v1733_v4 }
 0x352   : > { %v623_v51 = vmul.f32 1.442695, %v622_v49  ;;  %1562 = vmatpush3.msra.mxu0 %v1251_v47 }
 0x353   : > { %1649 = vpow2.f32 %v456_v50  ;;  %1563 = vmatprep.subr.mxu0 %v1733_v4 }
 0x354   : > { %1651 = vpow2.f32 %v623_v51 }
 0x357   : > { %v793_v61 = vpop.xlane.xlu0 %792 }
 0x358   : > { %v794_v62 = vsub.f32 %v790_v39, %v793_v61  ;;  %v1247_v61 = vld [vmem:[%s2089_s5 + $0x40] sm:$0xff] }
 0x35a   : > { %v795_v63 = vmul.f32 1.442695, %v794_v62  ;;  %v1246_v62 = vld [vmem:[%s2089_s5 + $0x38] sm:$0xff] }
 0x35f   : > { %v965_v52 = vpop.xlane.xlu1 %964 }
 0x360   : > { %v1650_v53 = vpop.eup %1649  ;;  %v966_v54 = vsub.f32 %v962_v43, %v965_v52  ;;  %v1150_v43 = vld [vmem:[%s2087_s3] sm:$0xff] }
 0x361   : > { %v1652_v55 = vpop.eup %1651  ;;  %v458_v56 = vsel %vm376_vm4, %v1650_v53, 0.0 }
 0x362   : > { %v967_v57 = vmul.f32 1.442695, %v966_v54  ;;  %459 = vadd.xlane.f32.xlu0 %v458_v56  ;;  %v625_v58 = vsel %vm376_vm4, %v1652_v55, 0.0 }
 0x363   : > { %626 = vadd.xlane.f32.xlu1 %v625_v58  ;;  %v631_v3 = vpop.permute.xlu1 %630  ;;  %v1250_v58 = vld [vmem:[%s2089_s5 + $0x58] sm:$0xff] }
 0x364   : > { %1653 = vpow2.f32 %v967_v57  ;;  %1564 = vmatpush3.msra.mxu0 %v1250_v58 }
 0x365   : > { %1655 = vpow2.f32 %v795_v63  ;;  %1565 = vmatprep.subr.mxu0 %v1733_v4  ;;  %v1245_v63 = vld [vmem:[%s2089_s5 + $0x30] sm:$0xff] }
 0x371   : > { %v1654_v59 = vpop.eup %1653 }
 0x372   : > { %v969_v60 = vsel %vm376_vm4, %v1654_v59, 0.0  ;;  %v1656_v1 = vpop.eup %1655 }
 0x373   : > { %970 = vadd.xlane.f32.xlu1 %v969_v60  ;;  %v797_v2 = vsel %vm376_vm4, %v1656_v1, 0.0  ;;  %v1248_v60 = vld [vmem:[%s2089_s5 + $0x48] sm:$0xff] }
 0x378   : > { %463 = vrot.lane.b32.xlu0 %v1874_v18, %s1743_s20  ;;  %s267_s20 = sand.u32 1, %s1723_s25  }
 0x379   : > { %s1335_s16 = scalar_lea.sflag [#allocation4], %s267_s20 }
 0x384   : > { %802 = vrot.lane.b32.xlu1 %v1874_v18, %s1744_s21  ;;  %s1411_s21 = sshll.u32 %s267_s20, 3 }
 0x385   : > { %s269_s8 = scalar_lea.vmem [#allocation3], %s1411_s21 }
 0x386   : > { %s1348_s9 = sshll.u32 %s269_s8, 4  ;;  %s1349_s9 = int_to_ptr.vmem [resolvable:$true] %s1348_s9 }
 0x387   : > { %s1671_s17 = scalar_lea.vmem %s1349_s9, 128 }
 0x388   : > { %p1672_p11 = scmp.ne.s32.totalorder %s1349_s9, %s1671_s17 }
 0x38a   : > { %p1673_p12 = pnand %p1672_p11, %p1828_p5 }
 0x38c   : > { %p1674_p13 = pneg %p1673_p12 }
 0x397   : > { %798 = vadd.xlane.f32.xlu0 %v797_v2  ;;  %v1243_v2 = vld [vmem:[%s2089_s5 + $0x20] sm:$0xff] }
 0x3ad   : > { %974 = vrot.lane.b32.xlu0 %v1874_v18, %s1745_s22 }
 0x3eb   : > { %v460_v5 = vpop.xlane.xlu0 %459 }
 0x3ec   : > { %1657 = vrcp.f32 %v460_v5  ;;  %v627_v6 = vpop.xlane.xlu1 %626  ;;  %v1241_v5 = vld [vmem:[%s2089_s5 + $0x10] sm:$0xff] }
 0x3ed   : > { %1659 = vrcp.f32 %v627_v6  ;;  %v1240_v6 = vld [vmem:[%s2089_s5 + $0x8] sm:$0xff] }
 0x3ef   : > { %v464_v7 = vpop.permute.xlu0 %463 }
 0x3f0   : > { %1499 = vmatpush3.msra.mxu1 %v464_v7  ;;  %v1239_v7 = vld [vmem:[%s2089_s5] sm:$0xff] }
 0x3f1   : > { %1508 = vmatprep.subr.mxu1 %v1733_v4 }
 0x3f9   : > { %v1658_v8 = vpop.eup %1657 }
 0x3fa   : > { %v462_v9 = vmul.f32 %v1658_v8, %v1650_v53  ;;  %v1660_v10 = vpop.eup %1659  ;;  %v1427_v8 = vld [vmem:[%s2088_s4] ss:$0 sm:$0xff] }
 0x3fb   : > { %v629_v12 = vmul.f32 %v1660_v10, %v1652_v55 }
 0x3fc   : > { %1501 = vmatmul.mubr.msk.f32.vlgmr.msra.gmra.mxu1 %vm376_vm4, %v462_v9  ;;  %v971_v11 = vpop.xlane.xlu1 %970 }
 0x3fd   : > { %1509 = vmatpush3.msra.mxu1 %v631_v3  ;;  %1510 = vmatprep.mubr.msk.f32.mxu1 %vm1734_vm1, %v1733_v4  ;;  %v1242_v3 = vld [vmem:[%s2089_s5 + $0x18] sm:$0xff] }
 0x3fe   : > { %1518 = vmatprep.subr.mxu1 %v1733_v4 }
 0x400   : > { %1511 = vmatmul.mubr.msk.f32.vlgmr.msra.gmra.mxu1 %vm376_vm4, %v629_v12  ;;  %v803_v13 = vpop.permute.xlu1 %802 }
 0x401   : > { %1519 = vmatpush3.msra.mxu1 %v803_v13  ;;  %1520 = vmatprep.mubr.msk.f32.mxu1 %vm1734_vm1, %v1733_v4 }
 0x402   : > { %1528 = vmatprep.subr.mxu1 %v1733_v4 }
 0x420   : > { %v799_v14 = vpop.xlane.xlu0 %798 }
 0x421   : > { %1661 = vrcp.f32 %v799_v14 }
 0x422   : > { %1663 = vrcp.f32 %v971_v11 }
 0x424   : > { %v975_v18 = vpop.permute.xlu0 %974 }
 0x42e   : > { %v1662_v15 = vpop.eup %1661 }
 0x42f   : > { %v801_v16 = vmul.f32 %v1662_v15, %v1656_v1  ;;  %v1664_v17 = vpop.eup %1663  ;;  %v1244_v1 = vld [vmem:[%s2089_s5 + $0x28] sm:$0xff] }
 0x430   : > { %v973_v19 = vmul.f32 %v1664_v17, %v1654_v59  ;;  %v1249_v59 = vld [vmem:[%s2089_s5 + $0x50] sm:$0xff] }
 0x431   : > { %1521 = vmatmul.mubr.msk.f32.vlgmr.msra.gmra.mxu1 %vm376_vm4, %v801_v16  ;;  %1566 = vmatpush3.msra.mxu0 %v1249_v59 }
 0x432   : > { %1529 = vmatpush3.msra.mxu1 %v975_v18  ;;  %1530 = vmatprep.mubr.msk.f32.mxu1 %vm1734_vm1, %v1733_v4 }
 0x433   : > { %1533 = vmatprep.subr.mxu1 %v1733_v4  ;;  %1567 = vmatprep.subr.mxu0 %v1733_v4 }
 0x434   : > { %1568 = vmatpush3.msra.mxu0 %v1248_v60 }
 0x435   : > { %1531 = vmatmul.mubr.msk.f32.vlgmr.msra.gmra.mxu1 %vm376_vm4, %v973_v19  ;;  %1569 = vmatprep.subr.mxu0 %v1733_v4 }
 0x436   : > { %1541 = vmatprep.mubr.msk.f32.mxu1 %vm1734_vm1, %v1733_v4  ;;  %1534 = vmatpush3.msra.mxu1 %v1060_v24 }
 0x437   : > { %1535 = vmatprep.subr.mxu1 %v1733_v4  ;;  %1570 = vmatpush3.msra.mxu0 %v1247_v61 }
 0x438   : > { %1536 = vmatpush3.msra.mxu1 %v1059_v25  ;;  %1571 = vmatprep.subr.mxu0 %v1733_v4 }
 0x439   : > { %1537 = vmatprep.subr.mxu1 %v1733_v4  ;;  %1572 = vmatpush3.msra.mxu0 %v1246_v62 }
 0x43a   : > { %1538 = vmatpush3.msra.mxu1 %v1058_v26  ;;  %1573 = vmatprep.subr.mxu0 %v1733_v4 }
 0x43b   : > { %1539 = vmatprep.subr.mxu1 %v1733_v4  ;;  %1574 = vmatpush3.msra.mxu0 %v1245_v63 }
 0x43c   : > { %1540 = vmatpush3.msra.mxu1 %v1057_v27  ;;  %1575 = vmatprep.subr.mxu0 %v1733_v4 }
 0x43d   : > { %1544 = vmatprep.subr.mxu1 %v1733_v4  ;;  %1576 = vmatpush3.msra.mxu0 %v1244_v1 }
 0x43e   : > { %1577 = vmatprep.subr.mxu0 %v1733_v4 }
 0x43f   : > { %1578 = vmatpush3.msra.mxu0 %v1243_v2 }
 0x440   : > { %1579 = vmatprep.subr.mxu0 %v1733_v4 }
 0x441   : > { %1580 = vmatpush3.msra.mxu0 %v1242_v3 }
 0x442   : > { %1581 = vmatprep.subr.mxu0 %v1733_v4 }
 0x443   : > { %1582 = vmatpush3.msra.mxu0 %v1241_v5 }
 0x444   : > { %1583 = vmatprep.subr.mxu0 %v1733_v4 }
 0x445   : > { %1584 = vmatpush3.msra.mxu0 %v1240_v6 }
 0x446   : > { %1585 = vmatprep.subr.mxu0 %v1733_v4 }
 0x447   : > { %1586 = vmatpush3.msra.mxu0 %v1239_v7 }
 0x4bc   : > { %v535_v20 = vpop.f32.mrf.mxu1 }
 0x4bd   : > { %539 = vst.msk [vmem:[#allocation2] sm:$0xff] %vm376_vm4, %v535_v20 }
 0x4be   : > { %v1502_v21 = vpop.f32.mrf.mxu1 }
 0x4c0   : > { %v702_v22 = vpop.f32.mrf.mxu1 }
 0x4c1   : > { %707 = vrot.lane.b32.xlu1 %v702_v22, %s1746_s23 }
 0x4c2   : > { %v1512_v23 = vpop.f32.mrf.mxu1 }
 0x4f1   : > { %v874_v28 = vpop.f32.mrf.mxu1 }
 0x4f2   : > { %879 = vrot.lane.b32.xlu0 %v874_v28, %s1747_s18  ;;  %s1675_s18 = sshll.u32 %s1749_s28, 4  ;;  %s1676_s18 = int_to_ptr.vmem [resolvable:$false] %s1675_s18 }
 0x4f3   : > { %v1522_v29 = vpop.f32.mrf.mxu1  ;;  %p1678_p0 = scmp.lt.s32.totalorder %s1349_s9, %s1676_s18 }
 0x4f5   : > { %v1046_v30 = vpop.f32.mrf.mxu1 }
 0x4f6   : > { %1051 = vrot.lane.b32.xlu1 %v1046_v30, %s1748_s19  ;;  %s1677_s19 = scalar_lea.vmem %s1676_s18, 256 }
 0x4f7   : > { %v1532_v31 = vpop.f32.mrf.mxu1  ;;  %p1679_p1 = scmp.lt.s32.totalorder %s1677_s19, %s1671_s17 }
 0x4f9   : > { %p1680_p2 = por %p1679_p1, %p1678_p0 }
 0x4fb   : > { %p1681_p3 = pnand %p1680_p2, %p1674_p13 }
 0x533   : > { %v708_v32 = vpop.permute.xlu1 %707 }
 0x534   : > { %711 = vst.msk [vmem:[#allocation2] sm:$0xff] %vm710_vm6, %v708_v32 }
 0x564   : > { %v880_v33 = vpop.permute.xlu0 %879 }
 0x565   : > { %883 = vst.msk [vmem:[#allocation2] sm:$0xff] %vm882_vm7, %v880_v33 }
 0x568   : > { %v1052_v34 = vpop.permute.xlu1 %1051 }
 0x569   : > { %1055 = vst.msk [vmem:[#allocation2] sm:$0xff] %vm1054_vm8, %v1052_v34 }
 0x570   : > { %v1056_v35 = vld [vmem:[#allocation2] sm:$0xff] }
 0x571   : > { %1542 = vmatmul.mubr.msk.f32.vlgmr.msra.gmra.mxu1 %vm276_vm0, %v1056_v35 }
 0x572   : > { %1552 = vmatprep.mubr.msk.f32.mxu1 %vm1734_vm1, %v1733_v4  ;;  %1545 = vmatpush3.msra.mxu1 %v1153_v41 }
 0x573   : > { %1546 = vmatprep.subr.mxu1 %v1733_v4 }
 0x574   : > { %1547 = vmatpush3.msra.mxu1 %v1152_v42 }
 0x575   : > { %1548 = vmatprep.subr.mxu1 %v1733_v4 }
 0x631   : > { %v1130_v36 = vpop.f32.mrf.mxu1 }
 0x632   : > { %v1957_v37 = vadd.f32 %v1130_v36, %v1843_v0  ;;  %v1151_v0 = vld [vmem:[%s2087_s3 + $0x8] sm:$0xff] }
 0x633   : > { %v1543_v38 = vpop.f32.mrf.mxu1  ;;  %1549 = vmatpush3.msra.mxu1 %v1151_v0 }
 0x634   : > { %v1135_v39 = vmul.f32 %v1957_v37, %v1957_v37  ;;  %1550 = vmatprep.subr.mxu1 %v1733_v4  ;;  %v1429_v4 = vld [vmem:[%s2090_s6] ss:$0 sm:$0xff] }
 0x635   : > { %1551 = vmatpush3.msra.mxu1 %v1150_v43 }
 0x636   : > { %v1136_v40 = vsel %vm276_vm0, %v1135_v39, 0.0 }
 0x637   : > { %1137 = vadd.xlane.f32.xlu0 %v1136_v40 }
 0x6c0   : > { %v1138_v48 = vpop.xlane.xlu0 %1137 }
 0x6c1   : > { %1665 = vrsqrt.f32 %v1138_v48  ;;  %vm1141_vm9 = vcmp.eq.f32.partialorder %v1138_v48, inf  ;;  %v1144_v51 = vand.u32 2147483648, %v1138_v48  ;;  %vm1143_vm10 = vcmp.eq.f32.partialorder %v1138_v48, 0.0 }
 0x6ce   : > { %v1666_v49 = vpop.eup %1665 }
 0x6cf   : > { %v1140_v50 = vmul.f32 %v1666_v49, %v1138_v48 }
 0x6d1   : > { %v1142_v52 = vsel %vm1141_vm9, %v1138_v48, %v1140_v50 }
 0x6d2   : > { %v1145_v53 = vsel %vm1143_vm10, %v1144_v51, %v1142_v52 }
 0x6d3   : > { %v1146_v54 = vmul.f32 0.17677669, %v1145_v53 }
 0x6d5   : > { %v1147_v55 = vadd.f32 1e-08, %v1146_v54 }
 0x6d7   : > { %1667 = vrcp.f32 %v1147_v55 }
 0x6e4   : > { %v1668_v56 = vpop.eup %1667 }
 0x6e5   : > { %v1149_v57 = vmul.f32 %v1668_v56, %v1957_v37 }
 0x6e7   : > { %1553 = vmatmul.mubr.msk.f32.vlgmr.msra.gmra.mxu1 %vm276_vm0, %v1149_v57 }
 0x7a7   : > { %v1230_v9 = vpop.f32.mrf.mxu1 }
 0x7a8   : > { %v1231_v10 = vadd.f32 %v1427_v8, %v1230_v9 }
 0x7a9   : > { %v1554_v11 = vpop.f32.mrf.mxu1 }
 0x7aa   : > { %v1235_v12 = vmul.f32 0.70710677, %v1231_v10  ;;  %v1234_v14 = vmul.f32 0.5, %v1231_v10 }
 0x7ac   : > { %1669 = verf.f32 %v1235_v12 }
 0x7b9   : > { %v1670_v13 = vpop.eup %1669 }
 0x7ba   : > { %v1237_v15 = vadd.f32 1.0, %v1670_v13 }
 0x7bc   : > { %v1238_v16 = vmul.f32 %v1237_v15, %v1234_v14 }
 0x7be   : > { %1588 = vmatmul.mubr.f32.vlgmr.msra.gmra.mxu0 %v1238_v16 }
 0x87e   : > { %v1328_v17 = vpop.f32.mrf.mxu0 }
 0x87f   : > { %v1329_v18 = vadd.f32 %v1429_v4, %v1328_v17 }
 0x880   : > { %v1589_v19 = vpop.f32.mrf.mxu0 }
 0x881   : > { %v1332_v20 = vadd.f32 %v1329_v18, %v1957_v37 }
 0x883   : > { %1333 = vst.msk [vmem:[%s269_s8] sm:$0xff] %vm276_vm0, %v1332_v20 }
 0x884   : > { %1684 = shalt.err (!%p1681_p3)
}
 0x885   : > { %s1685_s21 = scalar_lea.hbm %s1346_s15, 128  ;;  %s1689_s23 = scalar_lea.hbm %s2091_s7, 256 }
 0x886   : > { %p1686_p4 = scmp.ne.s32.totalorder %s1346_s15, %s1685_s21  ;;  %p1690_p9 = scmp.lt.s32.totalorder %s1346_s15, %s2091_s7 }
 0x887   : > { %p1691_p10 = scmp.lt.s32.totalorder %s1689_s23, %s1685_s21 }
 0x888   : > { %p1687_p7 = pnand %p1686_p4, %p1828_p5 }
 0x889   : > { %p1692_p11 = por %p1691_p10, %p1690_p9 }
 0x88a   : > { %p1688_p8 = pneg %p1687_p7 }
 0x88c   : > { %p1693_p12 = pnand %p1692_p11, %p1688_p8 }
 0x88e   : > { %1696 = shalt.err (!%p1693_p12)
}
 0x88f   : > { %1590 = dma.vmem_to_hbm [thread:$0]  (%p1828_p5), %s1349_s9, 128, %s1346_s15, %s1335_s16  }
 0x890 PF: > { %p1596_p13 = scmp.ge.s32.totalorder %s1731_s27, 2  ;;  %s1360_s13 = sand.u32 1, %s1719_s24  }
 0x891   : > { %s1361_s14 = scalar_lea.sflag [#allocation4], %s1360_s13 }
 0x892   : > { %p1593_p0 = pnand %p1596_p13, %p1832_p6 }
 0x894   : > { %p1594_p1 = pneg %p1593_p0 }
 0x896   : > { %1714 = dma.done.wait (%p1594_p1), %s1361_s14, 128  }
 0x897   : > { %1716 = vsyncadd (%p1594_p1), %s1361_s14, 4294967168  ;;  %p17_p2 = scmp.ge.s32.totalorder %s1815_s30, 4   ;;  %s2094_s24 = smov %s1723_s25 }
 0x898   : > { %s2095_s25 = smov %s1727_s26  ;;  %s2096_s26 = smov %s1826_s10 }
 0x899   : > { %s2097_s27 = smov %s1815_s30  ;;  %19 = sbr.rel (!%p17_p2) target bundleno = 3 (0x3), region = 83 }
 0x89e   :  { %1366 = vsyncpa [#allocation4], 1 }
 0x89f   :  { %1368 = vsyncpa [#allocation4 + $0x1], 1 }

</bundles_post_ra>
